<compile_context>
chip_gen: v7x
topology: tpu7x:2x2x1
jax: 0.10.0
libtpu: 0.0.40
codegen_flags: <defaults>
</compile_context>

<pallas_src>
import functools

import jax
import jax.numpy as jnp
from jax import lax
from jax.experimental import pallas as pl
from jax.experimental.pallas import tpu as pltpu

_EPS = 1e-5  # nn.InstanceNorm2d default eps (affine=False, no running stats)


def _round_up(n, m):
    return (n + m - 1) // m * m


def _pick_images_per_block(n, p_pad, images_per_block=None):
    """How many images to pack along the lane axis of one grid step."""
    if images_per_block is not None:
        return max(1, min(images_per_block, n))
    lane_target = 512     # >= 2 full MXU passes worth of lane columns per matmul
    lane_cap = 8192       # keep f32 taps + bf16 im2col comfortably inside VMEM
    b = max(1, min(-(-lane_target // p_pad), lane_cap // p_pad))
    if n >= 2:
        # Keep at least 2 grid steps so v7x's two TensorCores both get work
        # (no-op on v5e / v6e which have a single TensorCore).
        b = min(b, max(1, n // 2))
    return max(1, min(b, n))


def _double_conv_kernel(x_ref, mask_ref, w1_ref, b1_ref, w2_ref, b2_ref,
                        wa1_ref, ba1_ref, wa2_ref, ba2_ref, o_ref,
                        *, width, height, b_img, p_pad):
    """One grid step: B images packed along lanes, channels on sublanes."""
    L = x_ref.shape[-1]               # = b_img * p_pad
    p_img = height * width
    x = x_ref[...]                    # (cin_p, L)  f32
    masks = mask_ref[...]             # (9, L)      f32 {0,1} tap-validity masks
    mm_dtype = w1_ref.dtype           # bf16 (default) or f32 matmul operands

    offsets = [(dy, dx) for dy in (-1, 0, 1) for dx in (-1, 0, 1)]

    # Hoisted per-tap broadcasted masks, shared by both 3x3 convs (one set per
    # distinct channel count; JAX does not CSE broadcast_in_dim).
    bmask_cache = {}

    def tap_masks(c):
        if c not in bmask_cache:
            bmask_cache[c] = [
                None if offsets[k] == (0, 0)
                else jnp.broadcast_to(masks[k:k + 1, :], (c, L))
                for k in range(9)
            ]
        return bmask_cache[c]

    def conv3x3(v, w_ref, b_ref):
        # im2col via 9 masked lane rotations, then ONE MXU matmul against the
        # pre-reshaped (cout_p, 9*cin_p) weight.  Rolls wrap across image /
        # padding boundaries but every such tap is an edge tap and is masked.
        bm = tap_masks(v.shape[0])
        taps = []
        for k, (dy, dx) in enumerate(offsets):
            d = dy * width + dx
            if (dy, dx) == (0, 0):
                taps.append(v)
            else:
                t = v if d == 0 else pltpu.roll(v, shift=(-d) % L, axis=1)
                taps.append(t * bm[k])
        im2col = jnp.concatenate(taps, axis=0).astype(mm_dtype)   # (9*C, L)
        # Bias stays a separate f32 add; fold into the matmul only if the
        # bundle dump shows these lane broadcasts on the critical slot.
        return jnp.dot(w_ref[...], im2col,
                       preferred_element_type=jnp.float32) + b_ref[...]

    # Per-image InstanceNorm over the lane (flattened-spatial) axis.  The
    # per-image lane slices / concat are at multiples of 128 -> vreg aligned.
    if p_pad > p_img:
        pix_valid = (lax.broadcasted_iota(jnp.int32, (1, p_pad), 1)
                     < p_img).astype(jnp.float32)
    else:
        pix_valid = None
    inv_np = 1.0 / float(p_img)

    def instance_norm(v):
        outs = []
        for b in range(b_img):
            s = v[:, b * p_pad:(b + 1) * p_pad]
            if pix_valid is not None:
                s = s * pix_valid
            mean = jnp.sum(s, axis=1, keepdims=True) * inv_np
            cent = s - mean
            if pix_valid is not None:
                cent = cent * pix_valid          # keep padded lanes at zero
            var = jnp.sum(cent * cent, axis=1, keepdims=True) * inv_np
            outs.append(cent * lax.rsqrt(var + _EPS))
        return outs[0] if b_img == 1 else jnp.concatenate(outs, axis=1)

    # ---- double_conv: Conv3x3 -> IN -> ReLU -> Conv3x3 -> IN ----
    y = jnp.maximum(instance_norm(conv3x3(x, w1_ref, b1_ref)), 0.0)
    out_conv = instance_norm(conv3x3(y, w2_ref, b2_ref))

    # ---- attention_like: Conv1x1 -> IN -> ReLU -> Conv1x1 -> IN ----
    attn_in = jnp.concatenate([x, out_conv], axis=0).astype(mm_dtype)
    a = jnp.dot(wa1_ref[...], attn_in,
                preferred_element_type=jnp.float32) + ba1_ref[...]
    a = jnp.maximum(instance_norm(a), 0.0)
    a = jnp.dot(wa2_ref[...], a.astype(mm_dtype),
                preferred_element_type=jnp.float32) + ba2_ref[...]
    attn = instance_norm(a)

    # out = ReLU(2*tanh(attn) + out_conv).  Store the full 8-aligned cout_p
    # channel block (lane-dense, unmasked vst); wrapper slices the padding.
    o_ref[...] = jnp.maximum(2.0 * jnp.tanh(attn) + out_conv, 0.0)


def _prep_params(params, cin, cout, mm_dtype):
    """PyTorch-layout params -> channel-padded, matmul-ready kernel layout."""
    cin_p, cout_p = _round_up(cin, 8), _round_up(cout, 8)

    def conv3(w):  # (Cout, Cin, 3, 3) -> (CoutP, 9*CinP), tap-major columns
        co, ci = w.shape[0], w.shape[1]
        ci_p = _round_up(ci, 8)
        wt = jnp.transpose(w, (0, 2, 3, 1))                     # (Cout,3,3,Cin)
        wt = jnp.pad(wt, ((0, cout_p - co), (0, 0), (0, 0), (0, ci_p - ci)))
        return wt.reshape(cout_p, 9 * ci_p).astype(mm_dtype)

    def bias(b):   # biases stay f32 (added after the f32 accumulation)
        return jnp.pad(b, (0, cout_p - b.shape[0])).reshape(cout_p, 1)

    wa1 = params["wa1"][:, :, 0, 0]                             # (Cout, Cin+Cout)
    wa1x = jnp.pad(wa1[:, :cin], ((0, cout_p - cout), (0, cin_p - cin)))
    wa1o = jnp.pad(wa1[:, cin:], ((0, cout_p - cout), (0, cout_p - cout)))
    wa2 = jnp.pad(params["wa2"][:, :, 0, 0],
                  ((0, cout_p - cout), (0, cout_p - cout)))
    return dict(
        w1=conv3(params["w1"]), b1=bias(params["b1"]),
        w2=conv3(params["w2"]), b2=bias(params["b2"]),
        wa1=jnp.concatenate([wa1x, wa1o], axis=1).astype(mm_dtype),
        ba1=bias(params["ba1"]),
        wa2=wa2.astype(mm_dtype), ba2=bias(params["ba2"]),
    )


def double_conv_pallas(x, params, *, use_bf16_matmul=True, images_per_block=None):
    """DoubleConv forward. x: (N, Cin, H, W) f32 NCHW -> (N, Cout, H, W)."""
    n, cin, h, w = x.shape
    cout = params["w1"].shape[0]
    p_img = h * w
    p_pad = max(_round_up(p_img, 128), 128)       # lane-dense even when H*W<128
    cin_p, cout_p = _round_up(cin, 8), _round_up(cout, 8)
    mm_dtype = jnp.bfloat16 if use_bf16_matmul else jnp.float32

    b_img = _pick_images_per_block(n, p_pad, images_per_block)
    n_pad = _round_up(n, b_img)
    g = n_pad // b_img                             # grid steps
    L = b_img * p_pad                              # lanes per block

    kp = _prep_params(params, cin, cout, mm_dtype)

    # Layout plumbing (wrapper-side, cheap): NCHW -> per-step (cin_p, B*P_pad)
    # with image b occupying lanes [b*P_pad, (b+1)*P_pad).
    x_p = x.reshape(n, cin, p_img)
    x_p = jnp.pad(x_p, ((0, n_pad - n), (0, cin_p - cin), (0, p_pad - p_img)))
    x_p = x_p.reshape(g, b_img, cin_p, p_pad).transpose(0, 2, 1, 3)
    x_p = x_p.reshape(g, cin_p, L)

    # Static {0,1} edge masks for the 9 conv taps, per image, tiled B times.
    rows = jnp.arange(p_img, dtype=jnp.int32) // w
    cols = jnp.arange(p_img, dtype=jnp.int32) % w
    masks = []
    for dy in (-1, 0, 1):
        for dx in (-1, 0, 1):
            ok = ((rows + dy >= 0) & (rows + dy < h) &
                  (cols + dx >= 0) & (cols + dx < w))
            masks.append(ok)
    mask_img = jnp.stack(masks).astype(jnp.float32)              # (9, P_img)
    mask_img = jnp.pad(mask_img, ((0, 0), (0, p_pad - p_img)))   # (9, P_pad)
    mask_arr = jnp.tile(mask_img, (1, b_img))                    # (9, L)

    full = lambda a: pl.BlockSpec(a.shape, lambda i: (0,) * a.ndim)
    grid_spec = pltpu.PrefetchScalarGridSpec(
        num_scalar_prefetch=0,
        grid=(g,),
        in_specs=[
            pl.BlockSpec((None, cin_p, L), lambda i: (i, 0, 0)),
            full(mask_arr),
            full(kp["w1"]), full(kp["b1"]), full(kp["w2"]), full(kp["b2"]),
            full(kp["wa1"]), full(kp["ba1"]), full(kp["wa2"]), full(kp["ba2"]),
        ],
        out_specs=pl.BlockSpec((None, cout_p, L), lambda i: (i, 0, 0)),
    )
    out = pl.pallas_call(
        functools.partial(_double_conv_kernel, width=w, height=h,
                          b_img=b_img, p_pad=p_pad),
        out_shape=jax.ShapeDtypeStruct((g, cout_p, L), jnp.float32),
        grid_spec=grid_spec,
        # Toy shapes fit the default scoped VMEM easily; set vmem_limit_bytes
        # only when enlarging spatial tiles (v6e) / on v7x (64 MiB VMEM).
        compiler_params=pltpu.CompilerParams(
            dimension_semantics=("parallel",)),    # image blocks are independent
    )(x_p, mask_arr, kp["w1"], kp["b1"], kp["w2"], kp["b2"],
      kp["wa1"], kp["ba1"], kp["wa2"], kp["ba2"])

    # Undo layout plumbing: (g, cout_p, B*P_pad) -> (N, cout, H, W).
    out = out.reshape(g, cout_p, b_img, p_pad).transpose(0, 2, 1, 3)
    out = out.reshape(n_pad, cout_p, p_pad)[:n, :cout, :p_img]
    return out.reshape(n, cout, h, w)


def double_conv_reference(x, params, matmul_dtype=jnp.float32):
    """Pure-JAX reference (NCHW). matmul_dtype simulates the kernel's operand
    quantization (bf16 MXU inputs, f32 accumulation) for deliberate bf16 checks."""
    q = lambda a: a.astype(matmul_dtype).astype(jnp.float32)

    def conv(v, wt, b, pad):
        y = lax.conv_general_dilated(
            q(v), q(wt), window_strides=(1, 1), padding=((pad, pad), (pad, pad)),
            dimension_numbers=("NCHW", "OIHW", "NCHW"),
            precision=lax.Precision.HIGHEST)
        return y + b[None, :, None, None]

    def inorm(v):
        mean = jnp.mean(v, axis=(2, 3), keepdims=True)
        cent = v - mean
        var = jnp.mean(cent * cent, axis=(2, 3), keepdims=True)
        return cent * lax.rsqrt(var + _EPS)

    y = jnp.maximum(inorm(conv(x, params["w1"], params["b1"], 1)), 0.0)
    out_conv = inorm(conv(y, params["w2"], params["b2"], 1))
    attn_in = jnp.concatenate([x, out_conv], axis=1)
    a = jnp.maximum(inorm(conv(attn_in, params["wa1"], params["ba1"], 0)), 0.0)
    a = inorm(conv(a, params["wa2"], params["ba2"], 0))
    return jnp.maximum(2.0 * jnp.tanh(a) + out_conv, 0.0)


def init_params(key, in_channels, out_channels):
    """Deterministic parameters in PyTorch layout (OIHW weights, 1-D biases)."""
    ks = jax.random.split(key, 8)
    w = lambda k, s: 0.1 * jax.random.normal(k, s, jnp.float32)
    return dict(
        w1=w(ks[0], (out_channels, in_channels, 3, 3)),
        b1=w(ks[1], (out_channels,)),
        w2=w(ks[2], (out_channels, out_channels, 3, 3)),
        b2=w(ks[3], (out_channels,)),
        wa1=w(ks[4], (out_channels, in_channels + out_channels, 1, 1)),
        ba1=w(ks[5], (out_channels,)),
        wa2=w(ks[6], (out_channels, out_channels, 1, 1)),
        ba2=w(ks[7], (out_channels,)),
    )


if __name__ == "__main__":
    key = jax.random.PRNGKey(0)
    kx, kparam = jax.random.split(key)

    # N=4 exercises the batched path (2 images per grid step, grid of 2 steps).
    N, C_IN, C_OUT, H, W = 4, 4, 4, 16, 16
    x = jax.random.normal(kx, (N, C_IN, H, W), jnp.float32)
    params = init_params(kparam, C_IN, C_OUT)

    # f32-matmul path: tightened tolerance vs the pure-f32 reference.
    out_f32 = jax.jit(
        lambda v: double_conv_pallas(v, params, use_bf16_matmul=False))(x)
    jax.block_until_ready(out_f32)
    assert out_f32.shape == (N, C_OUT, H, W), out_f32.shape
    assert out_f32.dtype == jnp.float32, out_f32.dtype
    ref_f32 = jax.jit(lambda v: double_conv_reference(v, params))(x)
    err_f32 = float(jnp.max(jnp.abs(out_f32 - ref_f32)))
    assert err_f32 < 1e-3, f"f32 path mismatch vs reference: {err_f32}"

    # bf16-matmul path (default / perf path): validated deliberately against a
    # reference that applies the same operand quantization.
    fwd = jax.jit(lambda v: double_conv_pallas(v, params))
    out = fwd(x)
    jax.block_until_ready(out)
    assert out.shape == (N, C_OUT, H, W), out.shape
    assert out.dtype == jnp.float32, out.dtype
    ref_bf16 = jax.jit(
        lambda v: double_conv_reference(v, params, matmul_dtype=jnp.bfloat16))(x)
    err_bf16 = float(jnp.max(jnp.abs(out - ref_bf16)))
    assert err_bf16 < 1e-2, f"bf16 path mismatch vs bf16 reference: {err_bf16}"

    print("KERNEL_OK")
</pallas_src>

<mosaic_0001>
module attributes {stable_mosaic.version = 11 : i64} {
  func.func @_double_conv_kernel(%arg0: i32, %arg1: memref<1x8x512xf32, #tpu.memory_space<vmem>>, %arg2: memref<9x512xf32, #tpu.memory_space<vmem>>, %arg3: memref<8x72xf32, #tpu.memory_space<vmem>>, %arg4: memref<8x1xf32, #tpu.memory_space<vmem>>, %arg5: memref<8x72xf32, #tpu.memory_space<vmem>>, %arg6: memref<8x1xf32, #tpu.memory_space<vmem>>, %arg7: memref<8x16xf32, #tpu.memory_space<vmem>>, %arg8: memref<8x1xf32, #tpu.memory_space<vmem>>, %arg9: memref<8x8xf32, #tpu.memory_space<vmem>>, %arg10: memref<8x1xf32, #tpu.memory_space<vmem>>, %arg11: memref<1x8x512xf32, #tpu.memory_space<vmem>>) attributes {dimension_semantics = [#tpu.dimension_semantics<parallel>], iteration_bounds = array<i64: 2>, scalar_prefetch = 0 : i64, scratch_operands = 0 : i64, tpu.core_type = #tpu.core_type<tc>, window_params = [{transform_indices = @transform_0, window_bounds = array<i64: 1, 8, 512>}, {pipeline_mode = #tpu.pipeline_mode<synchronous>, transform_indices = @transform_1, window_bounds = array<i64: 9, 512>}, {pipeline_mode = #tpu.pipeline_mode<synchronous>, transform_indices = @transform_2, window_bounds = array<i64: 8, 72>}, {pipeline_mode = #tpu.pipeline_mode<synchronous>, transform_indices = @transform_3, window_bounds = array<i64: 8, 1>}, {pipeline_mode = #tpu.pipeline_mode<synchronous>, transform_indices = @transform_4, window_bounds = array<i64: 8, 72>}, {pipeline_mode = #tpu.pipeline_mode<synchronous>, transform_indices = @transform_5, window_bounds = array<i64: 8, 1>}, {pipeline_mode = #tpu.pipeline_mode<synchronous>, transform_indices = @transform_6, window_bounds = array<i64: 8, 16>}, {pipeline_mode = #tpu.pipeline_mode<synchronous>, transform_indices = @transform_7, window_bounds = array<i64: 8, 1>}, {pipeline_mode = #tpu.pipeline_mode<synchronous>, transform_indices = @transform_8, window_bounds = array<i64: 8, 8>}, {pipeline_mode = #tpu.pipeline_mode<synchronous>, transform_indices = @transform_9, window_bounds = array<i64: 8, 1>}, {transform_indices = @transform_10, window_bounds = array<i64: 1, 8, 512>}]} {
    %c0 = arith.constant 0 : index
    %c0_0 = arith.constant 0 : index
    %c0_1 = arith.constant 0 : index
    %0 = vector.load %arg1[%c0, %c0_0, %c0_1] : memref<1x8x512xf32, #tpu.memory_space<vmem>>, vector<1x8x512xf32>
    %1 = vector.shape_cast %0 : vector<1x8x512xf32> to vector<8x512xf32>
    %c0_2 = arith.constant 0 : index
    %c0_3 = arith.constant 0 : index
    %2 = vector.load %arg2[%c0_2, %c0_3] : memref<9x512xf32, #tpu.memory_space<vmem>>, vector<9x512xf32>
    %3 = vector.extract_strided_slice %2 {offsets = [0, 0], sizes = [1, 512], strides = [1, 1]} : vector<9x512xf32> to vector<1x512xf32>
    %4 = vector.shape_cast %3 : vector<1x512xf32> to vector<1x512xf32>
    %5 = vector.broadcast %4 : vector<1x512xf32> to vector<8x512xf32>
    %6 = vector.extract_strided_slice %2 {offsets = [1, 0], sizes = [1, 512], strides = [1, 1]} : vector<9x512xf32> to vector<1x512xf32>
    %7 = vector.shape_cast %6 : vector<1x512xf32> to vector<1x512xf32>
    %8 = vector.broadcast %7 : vector<1x512xf32> to vector<8x512xf32>
    %9 = vector.extract_strided_slice %2 {offsets = [2, 0], sizes = [1, 512], strides = [1, 1]} : vector<9x512xf32> to vector<1x512xf32>
    %10 = vector.shape_cast %9 : vector<1x512xf32> to vector<1x512xf32>
    %11 = vector.broadcast %10 : vector<1x512xf32> to vector<8x512xf32>
    %12 = vector.extract_strided_slice %2 {offsets = [3, 0], sizes = [1, 512], strides = [1, 1]} : vector<9x512xf32> to vector<1x512xf32>
    %13 = vector.shape_cast %12 : vector<1x512xf32> to vector<1x512xf32>
    %14 = vector.broadcast %13 : vector<1x512xf32> to vector<8x512xf32>
    %15 = vector.extract_strided_slice %2 {offsets = [5, 0], sizes = [1, 512], strides = [1, 1]} : vector<9x512xf32> to vector<1x512xf32>
    %16 = vector.shape_cast %15 : vector<1x512xf32> to vector<1x512xf32>
    %17 = vector.broadcast %16 : vector<1x512xf32> to vector<8x512xf32>
    %18 = vector.extract_strided_slice %2 {offsets = [6, 0], sizes = [1, 512], strides = [1, 1]} : vector<9x512xf32> to vector<1x512xf32>
    %19 = vector.shape_cast %18 : vector<1x512xf32> to vector<1x512xf32>
    %20 = vector.broadcast %19 : vector<1x512xf32> to vector<8x512xf32>
    %21 = vector.extract_strided_slice %2 {offsets = [7, 0], sizes = [1, 512], strides = [1, 1]} : vector<9x512xf32> to vector<1x512xf32>
    %22 = vector.shape_cast %21 : vector<1x512xf32> to vector<1x512xf32>
    %23 = vector.broadcast %22 : vector<1x512xf32> to vector<8x512xf32>
    %24 = vector.extract_strided_slice %2 {offsets = [8, 0], sizes = [1, 512], strides = [1, 1]} : vector<9x512xf32> to vector<1x512xf32>
    %25 = vector.shape_cast %24 : vector<1x512xf32> to vector<1x512xf32>
    %26 = vector.broadcast %25 : vector<1x512xf32> to vector<8x512xf32>
    %c17_i32 = arith.constant 17 : i32
    %27 = tpu.dynamic_rotate %1 by %c17_i32 dim 1 : vector<8x512xf32>, i32 -> vector<8x512xf32>
    %28 = arith.mulf %27, %5 : vector<8x512xf32>
    %c16_i32 = arith.constant 16 : i32
    %29 = tpu.dynamic_rotate %1 by %c16_i32 dim 1 : vector<8x512xf32>, i32 -> vector<8x512xf32>
    %30 = arith.mulf %29, %8 : vector<8x512xf32>
    %c15_i32 = arith.constant 15 : i32
    %31 = tpu.dynamic_rotate %1 by %c15_i32 dim 1 : vector<8x512xf32>, i32 -> vector<8x512xf32>
    %32 = arith.mulf %31, %11 : vector<8x512xf32>
    %c1_i32 = arith.constant 1 : i32
    %33 = tpu.dynamic_rotate %1 by %c1_i32 dim 1 : vector<8x512xf32>, i32 -> vector<8x512xf32>
    %34 = arith.mulf %33, %14 : vector<8x512xf32>
    %c511_i32 = arith.constant 511 : i32
    %35 = tpu.dynamic_rotate %1 by %c511_i32 dim 1 : vector<8x512xf32>, i32 -> vector<8x512xf32>
    %36 = arith.mulf %35, %17 : vector<8x512xf32>
    %c497_i32 = arith.constant 497 : i32
    %37 = tpu.dynamic_rotate %1 by %c497_i32 dim 1 : vector<8x512xf32>, i32 -> vector<8x512xf32>
    %38 = arith.mulf %37, %20 : vector<8x512xf32>
    %c496_i32 = arith.constant 496 : i32
    %39 = tpu.dynamic_rotate %1 by %c496_i32 dim 1 : vector<8x512xf32>, i32 -> vector<8x512xf32>
    %40 = arith.mulf %39, %23 : vector<8x512xf32>
    %c495_i32 = arith.constant 495 : i32
    %41 = tpu.dynamic_rotate %1 by %c495_i32 dim 1 : vector<8x512xf32>, i32 -> vector<8x512xf32>
    %42 = arith.mulf %41, %26 : vector<8x512xf32>
    %43 = tpu.concatenate %28, %30, %32, %34, %1, %36, %38, %40, %42 in 0 : vector<8x512xf32>, vector<8x512xf32>, vector<8x512xf32>, vector<8x512xf32>, vector<8x512xf32>, vector<8x512xf32>, vector<8x512xf32>, vector<8x512xf32>, vector<8x512xf32> -> vector<72x512xf32>
    %c0_4 = arith.constant 0 : index
    %c0_5 = arith.constant 0 : index
    %44 = vector.load %arg3[%c0_4, %c0_5] : memref<8x72xf32, #tpu.memory_space<vmem>>, vector<8x72xf32>
    %cst = arith.constant dense<0.000000e+00> : vector<8x512xf32>
    %45 = tpu.matmul %44, %43, %cst {dimension_numbers = #tpu.dot_dimension_numbers<[1], [0], [0], [1], [0, 0, 1, 1], [], []>} : vector<8x72xf32>, vector<72x512xf32>, vector<8x512xf32> -> vector<8x512xf32>
    %c0_6 = arith.constant 0 : index
    %c0_7 = arith.constant 0 : index
    %46 = vector.load %arg4[%c0_6, %c0_7] : memref<8x1xf32, #tpu.memory_space<vmem>>, vector<8x1xf32>
    %47 = vector.broadcast %46 : vector<8x1xf32> to vector<8x512xf32>
    %48 = arith.addf %45, %47 : vector<8x512xf32>
    %49 = vector.extract_strided_slice %48 {offsets = [0, 0], sizes = [8, 256], strides = [1, 1]} : vector<8x512xf32> to vector<8x256xf32>
    %cst_8 = arith.constant dense<0.000000e+00> : vector<8xf32>
    %50 = vector.multi_reduction <add>, %49, %cst_8 [1] : vector<8x256xf32> to vector<8xf32>
    %51 = vector.shape_cast %50 : vector<8xf32> to vector<8x1xf32>
    %cst_9 = arith.constant 3.906250e-03 : f32
    %52 = vector.broadcast %cst_9 : f32 to vector<8x1xf32>
    %53 = arith.mulf %51, %52 : vector<8x1xf32>
    %54 = vector.broadcast %53 : vector<8x1xf32> to vector<8x256xf32>
    %55 = arith.subf %49, %54 : vector<8x256xf32>
    %56 = arith.mulf %55, %55 : vector<8x256xf32>
    %cst_10 = arith.constant dense<0.000000e+00> : vector<8xf32>
    %57 = vector.multi_reduction <add>, %56, %cst_10 [1] : vector<8x256xf32> to vector<8xf32>
    %58 = vector.shape_cast %57 : vector<8xf32> to vector<8x1xf32>
    %cst_11 = arith.constant 3.906250e-03 : f32
    %59 = vector.broadcast %cst_11 : f32 to vector<8x1xf32>
    %60 = arith.mulf %58, %59 : vector<8x1xf32>
    %cst_12 = arith.constant 9.99999974E-6 : f32
    %61 = vector.broadcast %cst_12 : f32 to vector<8x1xf32>
    %62 = arith.addf %60, %61 : vector<8x1xf32>
    %63 = math.rsqrt %62 : vector<8x1xf32>
    %64 = vector.broadcast %63 : vector<8x1xf32> to vector<8x256xf32>
    %65 = arith.mulf %55, %64 : vector<8x256xf32>
    %66 = vector.extract_strided_slice %48 {offsets = [0, 256], sizes = [8, 256], strides = [1, 1]} : vector<8x512xf32> to vector<8x256xf32>
    %cst_13 = arith.constant dense<0.000000e+00> : vector<8xf32>
    %67 = vector.multi_reduction <add>, %66, %cst_13 [1] : vector<8x256xf32> to vector<8xf32>
    %68 = vector.shape_cast %67 : vector<8xf32> to vector<8x1xf32>
    %cst_14 = arith.constant 3.906250e-03 : f32
    %69 = vector.broadcast %cst_14 : f32 to vector<8x1xf32>
    %70 = arith.mulf %68, %69 : vector<8x1xf32>
    %71 = vector.broadcast %70 : vector<8x1xf32> to vector<8x256xf32>
    %72 = arith.subf %66, %71 : vector<8x256xf32>
    %73 = arith.mulf %72, %72 : vector<8x256xf32>
    %cst_15 = arith.constant dense<0.000000e+00> : vector<8xf32>
    %74 = vector.multi_reduction <add>, %73, %cst_15 [1] : vector<8x256xf32> to vector<8xf32>
    %75 = vector.shape_cast %74 : vector<8xf32> to vector<8x1xf32>
    %cst_16 = arith.constant 3.906250e-03 : f32
    %76 = vector.broadcast %cst_16 : f32 to vector<8x1xf32>
    %77 = arith.mulf %75, %76 : vector<8x1xf32>
    %cst_17 = arith.constant 9.99999974E-6 : f32
    %78 = vector.broadcast %cst_17 : f32 to vector<8x1xf32>
    %79 = arith.addf %77, %78 : vector<8x1xf32>
    %80 = math.rsqrt %79 : vector<8x1xf32>
    %81 = vector.broadcast %80 : vector<8x1xf32> to vector<8x256xf32>
    %82 = arith.mulf %72, %81 : vector<8x256xf32>
    %83 = tpu.concatenate %65, %82 in 1 : vector<8x256xf32>, vector<8x256xf32> -> vector<8x512xf32>
    %cst_18 = arith.constant 0.000000e+00 : f32
    %84 = vector.broadcast %cst_18 : f32 to vector<8x512xf32>
    %85 = arith.maximumf %83, %84 : vector<8x512xf32>
    %c17_i32_19 = arith.constant 17 : i32
    %86 = tpu.dynamic_rotate %85 by %c17_i32_19 dim 1 : vector<8x512xf32>, i32 -> vector<8x512xf32>
    %87 = arith.mulf %86, %5 : vector<8x512xf32>
    %c16_i32_20 = arith.constant 16 : i32
    %88 = tpu.dynamic_rotate %85 by %c16_i32_20 dim 1 : vector<8x512xf32>, i32 -> vector<8x512xf32>
    %89 = arith.mulf %88, %8 : vector<8x512xf32>
    %c15_i32_21 = arith.constant 15 : i32
    %90 = tpu.dynamic_rotate %85 by %c15_i32_21 dim 1 : vector<8x512xf32>, i32 -> vector<8x512xf32>
    %91 = arith.mulf %90, %11 : vector<8x512xf32>
    %c1_i32_22 = arith.constant 1 : i32
    %92 = tpu.dynamic_rotate %85 by %c1_i32_22 dim 1 : vector<8x512xf32>, i32 -> vector<8x512xf32>
    %93 = arith.mulf %92, %14 : vector<8x512xf32>
    %c511_i32_23 = arith.constant 511 : i32
    %94 = tpu.dynamic_rotate %85 by %c511_i32_23 dim 1 : vector<8x512xf32>, i32 -> vector<8x512xf32>
    %95 = arith.mulf %94, %17 : vector<8x512xf32>
    %c497_i32_24 = arith.constant 497 : i32
    %96 = tpu.dynamic_rotate %85 by %c497_i32_24 dim 1 : vector<8x512xf32>, i32 -> vector<8x512xf32>
    %97 = arith.mulf %96, %20 : vector<8x512xf32>
    %c496_i32_25 = arith.constant 496 : i32
    %98 = tpu.dynamic_rotate %85 by %c496_i32_25 dim 1 : vector<8x512xf32>, i32 -> vector<8x512xf32>
    %99 = arith.mulf %98, %23 : vector<8x512xf32>
    %c495_i32_26 = arith.constant 495 : i32
    %100 = tpu.dynamic_rotate %85 by %c495_i32_26 dim 1 : vector<8x512xf32>, i32 -> vector<8x512xf32>
    %101 = arith.mulf %100, %26 : vector<8x512xf32>
    %102 = tpu.concatenate %87, %89, %91, %93, %85, %95, %97, %99, %101 in 0 : vector<8x512xf32>, vector<8x512xf32>, vector<8x512xf32>, vector<8x512xf32>, vector<8x512xf32>, vector<8x512xf32>, vector<8x512xf32>, vector<8x512xf32>, vector<8x512xf32> -> vector<72x512xf32>
    %c0_27 = arith.constant 0 : index
    %c0_28 = arith.constant 0 : index
    %103 = vector.load %arg5[%c0_27, %c0_28] : memref<8x72xf32, #tpu.memory_space<vmem>>, vector<8x72xf32>
    %cst_29 = arith.constant dense<0.000000e+00> : vector<8x512xf32>
    %104 = tpu.matmul %103, %102, %cst_29 {dimension_numbers = #tpu.dot_dimension_numbers<[1], [0], [0], [1], [0, 0, 1, 1], [], []>} : vector<8x72xf32>, vector<72x512xf32>, vector<8x512xf32> -> vector<8x512xf32>
    %c0_30 = arith.constant 0 : index
    %c0_31 = arith.constant 0 : index
    %105 = vector.load %arg6[%c0_30, %c0_31] : memref<8x1xf32, #tpu.memory_space<vmem>>, vector<8x1xf32>
    %106 = vector.broadcast %105 : vector<8x1xf32> to vector<8x512xf32>
    %107 = arith.addf %104, %106 : vector<8x512xf32>
    %108 = vector.extract_strided_slice %107 {offsets = [0, 0], sizes = [8, 256], strides = [1, 1]} : vector<8x512xf32> to vector<8x256xf32>
    %cst_32 = arith.constant dense<0.000000e+00> : vector<8xf32>
    %109 = vector.multi_reduction <add>, %108, %cst_32 [1] : vector<8x256xf32> to vector<8xf32>
    %110 = vector.shape_cast %109 : vector<8xf32> to vector<8x1xf32>
    %cst_33 = arith.constant 3.906250e-03 : f32
    %111 = vector.broadcast %cst_33 : f32 to vector<8x1xf32>
    %112 = arith.mulf %110, %111 : vector<8x1xf32>
    %113 = vector.broadcast %112 : vector<8x1xf32> to vector<8x256xf32>
    %114 = arith.subf %108, %113 : vector<8x256xf32>
    %115 = arith.mulf %114, %114 : vector<8x256xf32>
    %cst_34 = arith.constant dense<0.000000e+00> : vector<8xf32>
    %116 = vector.multi_reduction <add>, %115, %cst_34 [1] : vector<8x256xf32> to vector<8xf32>
    %117 = vector.shape_cast %116 : vector<8xf32> to vector<8x1xf32>
    %cst_35 = arith.constant 3.906250e-03 : f32
    %118 = vector.broadcast %cst_35 : f32 to vector<8x1xf32>
    %119 = arith.mulf %117, %118 : vector<8x1xf32>
    %cst_36 = arith.constant 9.99999974E-6 : f32
    %120 = vector.broadcast %cst_36 : f32 to vector<8x1xf32>
    %121 = arith.addf %119, %120 : vector<8x1xf32>
    %122 = math.rsqrt %121 : vector<8x1xf32>
    %123 = vector.broadcast %122 : vector<8x1xf32> to vector<8x256xf32>
    %124 = arith.mulf %114, %123 : vector<8x256xf32>
    %125 = vector.extract_strided_slice %107 {offsets = [0, 256], sizes = [8, 256], strides = [1, 1]} : vector<8x512xf32> to vector<8x256xf32>
    %cst_37 = arith.constant dense<0.000000e+00> : vector<8xf32>
    %126 = vector.multi_reduction <add>, %125, %cst_37 [1] : vector<8x256xf32> to vector<8xf32>
    %127 = vector.shape_cast %126 : vector<8xf32> to vector<8x1xf32>
    %cst_38 = arith.constant 3.906250e-03 : f32
    %128 = vector.broadcast %cst_38 : f32 to vector<8x1xf32>
    %129 = arith.mulf %127, %128 : vector<8x1xf32>
    %130 = vector.broadcast %129 : vector<8x1xf32> to vector<8x256xf32>
    %131 = arith.subf %125, %130 : vector<8x256xf32>
    %132 = arith.mulf %131, %131 : vector<8x256xf32>
    %cst_39 = arith.constant dense<0.000000e+00> : vector<8xf32>
    %133 = vector.multi_reduction <add>, %132, %cst_39 [1] : vector<8x256xf32> to vector<8xf32>
    %134 = vector.shape_cast %133 : vector<8xf32> to vector<8x1xf32>
    %cst_40 = arith.constant 3.906250e-03 : f32
    %135 = vector.broadcast %cst_40 : f32 to vector<8x1xf32>
    %136 = arith.mulf %134, %135 : vector<8x1xf32>
    %cst_41 = arith.constant 9.99999974E-6 : f32
    %137 = vector.broadcast %cst_41 : f32 to vector<8x1xf32>
    %138 = arith.addf %136, %137 : vector<8x1xf32>
    %139 = math.rsqrt %138 : vector<8x1xf32>
    %140 = vector.broadcast %139 : vector<8x1xf32> to vector<8x256xf32>
    %141 = arith.mulf %131, %140 : vector<8x256xf32>
    %142 = tpu.concatenate %124, %141 in 1 : vector<8x256xf32>, vector<8x256xf32> -> vector<8x512xf32>
    %143 = tpu.concatenate %1, %142 in 0 : vector<8x512xf32>, vector<8x512xf32> -> vector<16x512xf32>
    %c0_42 = arith.constant 0 : index
    %c0_43 = arith.constant 0 : index
    %144 = vector.load %arg7[%c0_42, %c0_43] : memref<8x16xf32, #tpu.memory_space<vmem>>, vector<8x16xf32>
    %cst_44 = arith.constant dense<0.000000e+00> : vector<8x512xf32>
    %145 = tpu.matmul %144, %143, %cst_44 {dimension_numbers = #tpu.dot_dimension_numbers<[1], [0], [0], [1], [0, 0, 1, 1], [], []>} : vector<8x16xf32>, vector<16x512xf32>, vector<8x512xf32> -> vector<8x512xf32>
    %c0_45 = arith.constant 0 : index
    %c0_46 = arith.constant 0 : index
    %146 = vector.load %arg8[%c0_45, %c0_46] : memref<8x1xf32, #tpu.memory_space<vmem>>, vector<8x1xf32>
    %147 = vector.broadcast %146 : vector<8x1xf32> to vector<8x512xf32>
    %148 = arith.addf %145, %147 : vector<8x512xf32>
    %149 = vector.extract_strided_slice %148 {offsets = [0, 0], sizes = [8, 256], strides = [1, 1]} : vector<8x512xf32> to vector<8x256xf32>
    %cst_47 = arith.constant dense<0.000000e+00> : vector<8xf32>
    %150 = vector.multi_reduction <add>, %149, %cst_47 [1] : vector<8x256xf32> to vector<8xf32>
    %151 = vector.shape_cast %150 : vector<8xf32> to vector<8x1xf32>
    %cst_48 = arith.constant 3.906250e-03 : f32
    %152 = vector.broadcast %cst_48 : f32 to vector<8x1xf32>
    %153 = arith.mulf %151, %152 : vector<8x1xf32>
    %154 = vector.broadcast %153 : vector<8x1xf32> to vector<8x256xf32>
    %155 = arith.subf %149, %154 : vector<8x256xf32>
    %156 = arith.mulf %155, %155 : vector<8x256xf32>
    %cst_49 = arith.constant dense<0.000000e+00> : vector<8xf32>
    %157 = vector.multi_reduction <add>, %156, %cst_49 [1] : vector<8x256xf32> to vector<8xf32>
    %158 = vector.shape_cast %157 : vector<8xf32> to vector<8x1xf32>
    %cst_50 = arith.constant 3.906250e-03 : f32
    %159 = vector.broadcast %cst_50 : f32 to vector<8x1xf32>
    %160 = arith.mulf %158, %159 : vector<8x1xf32>
    %cst_51 = arith.constant 9.99999974E-6 : f32
    %161 = vector.broadcast %cst_51 : f32 to vector<8x1xf32>
    %162 = arith.addf %160, %161 : vector<8x1xf32>
    %163 = math.rsqrt %162 : vector<8x1xf32>
    %164 = vector.broadcast %163 : vector<8x1xf32> to vector<8x256xf32>
    %165 = arith.mulf %155, %164 : vector<8x256xf32>
    %166 = vector.extract_strided_slice %148 {offsets = [0, 256], sizes = [8, 256], strides = [1, 1]} : vector<8x512xf32> to vector<8x256xf32>
    %cst_52 = arith.constant dense<0.000000e+00> : vector<8xf32>
    %167 = vector.multi_reduction <add>, %166, %cst_52 [1] : vector<8x256xf32> to vector<8xf32>
    %168 = vector.shape_cast %167 : vector<8xf32> to vector<8x1xf32>
    %cst_53 = arith.constant 3.906250e-03 : f32
    %169 = vector.broadcast %cst_53 : f32 to vector<8x1xf32>
    %170 = arith.mulf %168, %169 : vector<8x1xf32>
    %171 = vector.broadcast %170 : vector<8x1xf32> to vector<8x256xf32>
    %172 = arith.subf %166, %171 : vector<8x256xf32>
    %173 = arith.mulf %172, %172 : vector<8x256xf32>
    %cst_54 = arith.constant dense<0.000000e+00> : vector<8xf32>
    %174 = vector.multi_reduction <add>, %173, %cst_54 [1] : vector<8x256xf32> to vector<8xf32>
    %175 = vector.shape_cast %174 : vector<8xf32> to vector<8x1xf32>
    %cst_55 = arith.constant 3.906250e-03 : f32
    %176 = vector.broadcast %cst_55 : f32 to vector<8x1xf32>
    %177 = arith.mulf %175, %176 : vector<8x1xf32>
    %cst_56 = arith.constant 9.99999974E-6 : f32
    %178 = vector.broadcast %cst_56 : f32 to vector<8x1xf32>
    %179 = arith.addf %177, %178 : vector<8x1xf32>
    %180 = math.rsqrt %179 : vector<8x1xf32>
    %181 = vector.broadcast %180 : vector<8x1xf32> to vector<8x256xf32>
    %182 = arith.mulf %172, %181 : vector<8x256xf32>
    %183 = tpu.concatenate %165, %182 in 1 : vector<8x256xf32>, vector<8x256xf32> -> vector<8x512xf32>
    %cst_57 = arith.constant 0.000000e+00 : f32
    %184 = vector.broadcast %cst_57 : f32 to vector<8x512xf32>
    %185 = arith.maximumf %183, %184 : vector<8x512xf32>
    %c0_58 = arith.constant 0 : index
    %c0_59 = arith.constant 0 : index
    %186 = vector.load %arg9[%c0_58, %c0_59] : memref<8x8xf32, #tpu.memory_space<vmem>>, vector<8x8xf32>
    %cst_60 = arith.constant dense<0.000000e+00> : vector<8x512xf32>
    %187 = tpu.matmul %186, %185, %cst_60 {dimension_numbers = #tpu.dot_dimension_numbers<[1], [0], [0], [1], [0, 0, 1, 1], [], []>} : vector<8x8xf32>, vector<8x512xf32>, vector<8x512xf32> -> vector<8x512xf32>
    %c0_61 = arith.constant 0 : index
    %c0_62 = arith.constant 0 : index
    %188 = vector.load %arg10[%c0_61, %c0_62] : memref<8x1xf32, #tpu.memory_space<vmem>>, vector<8x1xf32>
    %189 = vector.broadcast %188 : vector<8x1xf32> to vector<8x512xf32>
    %190 = arith.addf %187, %189 : vector<8x512xf32>
    %191 = vector.extract_strided_slice %190 {offsets = [0, 0], sizes = [8, 256], strides = [1, 1]} : vector<8x512xf32> to vector<8x256xf32>
    %cst_63 = arith.constant dense<0.000000e+00> : vector<8xf32>
    %192 = vector.multi_reduction <add>, %191, %cst_63 [1] : vector<8x256xf32> to vector<8xf32>
    %193 = vector.shape_cast %192 : vector<8xf32> to vector<8x1xf32>
    %cst_64 = arith.constant 3.906250e-03 : f32
    %194 = vector.broadcast %cst_64 : f32 to vector<8x1xf32>
    %195 = arith.mulf %193, %194 : vector<8x1xf32>
    %196 = vector.broadcast %195 : vector<8x1xf32> to vector<8x256xf32>
    %197 = arith.subf %191, %196 : vector<8x256xf32>
    %198 = arith.mulf %197, %197 : vector<8x256xf32>
    %cst_65 = arith.constant dense<0.000000e+00> : vector<8xf32>
    %199 = vector.multi_reduction <add>, %198, %cst_65 [1] : vector<8x256xf32> to vector<8xf32>
    %200 = vector.shape_cast %199 : vector<8xf32> to vector<8x1xf32>
    %cst_66 = arith.constant 3.906250e-03 : f32
    %201 = vector.broadcast %cst_66 : f32 to vector<8x1xf32>
    %202 = arith.mulf %200, %201 : vector<8x1xf32>
    %cst_67 = arith.constant 9.99999974E-6 : f32
    %203 = vector.broadcast %cst_67 : f32 to vector<8x1xf32>
    %204 = arith.addf %202, %203 : vector<8x1xf32>
    %205 = math.rsqrt %204 : vector<8x1xf32>
    %206 = vector.broadcast %205 : vector<8x1xf32> to vector<8x256xf32>
    %207 = arith.mulf %197, %206 : vector<8x256xf32>
    %208 = vector.extract_strided_slice %190 {offsets = [0, 256], sizes = [8, 256], strides = [1, 1]} : vector<8x512xf32> to vector<8x256xf32>
    %cst_68 = arith.constant dense<0.000000e+00> : vector<8xf32>
    %209 = vector.multi_reduction <add>, %208, %cst_68 [1] : vector<8x256xf32> to vector<8xf32>
    %210 = vector.shape_cast %209 : vector<8xf32> to vector<8x1xf32>
    %cst_69 = arith.constant 3.906250e-03 : f32
    %211 = vector.broadcast %cst_69 : f32 to vector<8x1xf32>
    %212 = arith.mulf %210, %211 : vector<8x1xf32>
    %213 = vector.broadcast %212 : vector<8x1xf32> to vector<8x256xf32>
    %214 = arith.subf %208, %213 : vector<8x256xf32>
    %215 = arith.mulf %214, %214 : vector<8x256xf32>
    %cst_70 = arith.constant dense<0.000000e+00> : vector<8xf32>
    %216 = vector.multi_reduction <add>, %215, %cst_70 [1] : vector<8x256xf32> to vector<8xf32>
    %217 = vector.shape_cast %216 : vector<8xf32> to vector<8x1xf32>
    %cst_71 = arith.constant 3.906250e-03 : f32
    %218 = vector.broadcast %cst_71 : f32 to vector<8x1xf32>
    %219 = arith.mulf %217, %218 : vector<8x1xf32>
    %cst_72 = arith.constant 9.99999974E-6 : f32
    %220 = vector.broadcast %cst_72 : f32 to vector<8x1xf32>
    %221 = arith.addf %219, %220 : vector<8x1xf32>
    %222 = math.rsqrt %221 : vector<8x1xf32>
    %223 = vector.broadcast %222 : vector<8x1xf32> to vector<8x256xf32>
    %224 = arith.mulf %214, %223 : vector<8x256xf32>
    %225 = tpu.concatenate %207, %224 in 1 : vector<8x256xf32>, vector<8x256xf32> -> vector<8x512xf32>
    %226 = math.tanh %225 : vector<8x512xf32>
    %cst_73 = arith.constant 2.000000e+00 : f32
    %227 = vector.broadcast %cst_73 : f32 to vector<8x512xf32>
    %228 = arith.mulf %227, %226 : vector<8x512xf32>
    %229 = arith.addf %228, %142 : vector<8x512xf32>
    %cst_74 = arith.constant 0.000000e+00 : f32
    %230 = vector.broadcast %cst_74 : f32 to vector<8x512xf32>
    %231 = arith.maximumf %229, %230 : vector<8x512xf32>
    %c0_75 = arith.constant 0 : index
    %c0_76 = arith.constant 0 : index
    %c0_77 = arith.constant 0 : index
    %232 = vector.load %arg11[%c0_75, %c0_76, %c0_77] : memref<1x8x512xf32, #tpu.memory_space<vmem>>, vector<1x8x512xf32>
    %233 = vector.shape_cast %232 : vector<1x8x512xf32> to vector<8x512xf32>
    %234 = vector.shape_cast %231 : vector<8x512xf32> to vector<1x8x512xf32>
    tpu.vector_store %arg11[%c0_75, %c0_76, %c0_77], %234 {strides = array<i32>} : memref<1x8x512xf32, #tpu.memory_space<vmem>>, vector<1x8x512xf32>,
    return
  }
  func.func @transform_0(%arg0: i32) -> (i32, i32, i32) {
    %c0_i32 = arith.constant 0 : i32
    %c0_i32_0 = arith.constant 0 : i32
    %c0_i32_1 = arith.constant 0 : i32
    return %arg0, %c0_i32, %c0_i32_0 : i32, i32, i32
  }
  func.func @transform_1(%arg0: i32) -> (i32, i32) {
    %c0_i32 = arith.constant 0 : i32
    %c0_i32_0 = arith.constant 0 : i32
    %c0_i32_1 = arith.constant 0 : i32
    return %c0_i32, %c0_i32_0 : i32, i32
  }
  func.func @transform_2(%arg0: i32) -> (i32, i32) {
    %c0_i32 = arith.constant 0 : i32
    %c0_i32_0 = arith.constant 0 : i32
    %c0_i32_1 = arith.constant 0 : i32
    return %c0_i32, %c0_i32_0 : i32, i32
  }
  func.func @transform_3(%arg0: i32) -> (i32, i32) {
    %c0_i32 = arith.constant 0 : i32
    %c0_i32_0 = arith.constant 0 : i32
    %c0_i32_1 = arith.constant 0 : i32
    return %c0_i32, %c0_i32_0 : i32, i32
  }
  func.func @transform_4(%arg0: i32) -> (i32, i32) {
    %c0_i32 = arith.constant 0 : i32
    %c0_i32_0 = arith.constant 0 : i32
    %c0_i32_1 = arith.constant 0 : i32
    return %c0_i32, %c0_i32_0 : i32, i32
  }
  func.func @transform_5(%arg0: i32) -> (i32, i32) {
    %c0_i32 = arith.constant 0 : i32
    %c0_i32_0 = arith.constant 0 : i32
    %c0_i32_1 = arith.constant 0 : i32
    return %c0_i32, %c0_i32_0 : i32, i32
  }
  func.func @transform_6(%arg0: i32) -> (i32, i32) {
    %c0_i32 = arith.constant 0 : i32
    %c0_i32_0 = arith.constant 0 : i32
    %c0_i32_1 = arith.constant 0 : i32
    return %c0_i32, %c0_i32_0 : i32, i32
  }
  func.func @transform_7(%arg0: i32) -> (i32, i32) {
    %c0_i32 = arith.constant 0 : i32
    %c0_i32_0 = arith.constant 0 : i32
    %c0_i32_1 = arith.constant 0 : i32
    return %c0_i32, %c0_i32_0 : i32, i32
  }
  func.func @transform_8(%arg0: i32) -> (i32, i32) {
    %c0_i32 = arith.constant 0 : i32
    %c0_i32_0 = arith.constant 0 : i32
    %c0_i32_1 = arith.constant 0 : i32
    return %c0_i32, %c0_i32_0 : i32, i32
  }
  func.func @transform_9(%arg0: i32) -> (i32, i32) {
    %c0_i32 = arith.constant 0 : i32
    %c0_i32_0 = arith.constant 0 : i32
    %c0_i32_1 = arith.constant 0 : i32
    return %c0_i32, %c0_i32_0 : i32, i32
  }
  func.func @transform_10(%arg0: i32) -> (i32, i32, i32) {
    %c0_i32 = arith.constant 0 : i32
    %c0_i32_0 = arith.constant 0 : i32
    %c0_i32_1 = arith.constant 0 : i32
    return %arg0, %c0_i32, %c0_i32_0 : i32, i32, i32
  }
}

</mosaic_0001>

<bundles_post_ra>
// kernel: _lambda_.1
= control target key start
LH: loop header
LB: loop body
LE: loop exit
PB: predicated region body
PF: predicated region fallthrough
CT: control target
= control target key end

     0   :  { %s1803_s13 = smov 0   ;;  %s2376_s0 = inlined_call_operand.vmem [shape: f32[2,8,512], index: 0, kind: input, shape index: {}]   ;;  %s2377_s1 = inlined_call_operand.vmem [shape: f32[9,512], index: 1, kind: input, shape index: {}]   ;;  %s2378_s2 = inlined_call_operand.vmem [shape: f32[8,72], index: 2, kind: input, shape index: {}]   ;;  %s2379_s3 = inlined_call_operand.vmem [shape: f32[8,1], index: 3, kind: input, shape index: {}]   ;;  %s2380_s4 = inlined_call_operand.vmem [shape: f32[8,72], index: 4, kind: input, shape index: {}]   ;;  %s2381_s5 = inlined_call_operand.vmem [shape: f32[8,1], index: 5, kind: input, shape index: {}]   ;;  %s2382_s6 = inlined_call_operand.vmem [shape: f32[8,16], index: 6, kind: input, shape index: {}]   ;;  %s2383_s7 = inlined_call_operand.vmem [shape: f32[8,1], index: 7, kind: input, shape index: {}]   ;;  %s2384_s8 = inlined_call_operand.vmem [shape: f32[8,8], index: 8, kind: input, shape index: {}]   ;;  %s2385_s9 = inlined_call_operand.vmem [shape: f32[8,1], index: 9, kind: input, shape index: {}]   ;;  %s2386_s10 = inlined_call_operand.vmem [shape: f32[2,8,512], index: 10, kind: output, shape index: {}]  }
   0x1 LB: > { %s1588_s14 = sadd.s32 4294967295, %s1736_s13   ;;  %p1592_p0 = scmp.ge.s32.totalorder %s1736_s13, 1  ;;  %s1736_s13 = sphi %s1803_s13, %s20_s13  }
   0x2   : > { %p312_p1 = scmp.lt.s32.totalorder %s1736_s13, 3 }
   0x4   : > { %p313_p2 = pnand %p1592_p0, %p312_p1 }
   0x5   : > { %p350_p3 = scmp.lt.s32.totalorder (!%p313_p2), %s1588_s14, 1  ;;  %s1738_s19 = smov (!%p313_p2), 17   ;;  %v1745_v4 = vmov (!%p313_p2), 0.0   ;;  %v1746_v5 = vmov (!%p313_p2), 0   ;;  %v639_v6 = vld [vmem:[%s2379_s3] sm:$0xff] (!%p313_p2)  ;;  %v372_v7 = vlaneseq (!%p313_p2)  ;;  %v1911_v14 = vld [vmem:[%s2377_s1 + $0x8] sm:$0xff] (!%p313_p2) }
   0x6   : > { %316 = sbr.rel (%p313_p2) target bundleno = 2517 (0x9d5), region = 60  ;;  %s1739_s20 = smov (!%p313_p2), 16   ;;  %713 = vmatprep.mubr.f32.mxu0 (!%p313_p2), %v1745_v4  ;;  %784 = vmatprep.mubr.f32.mxu1 (!%p313_p2), %v1745_v4  ;;  %v1917_v17 = vld [vmem:[%s2377_s1] sm:$0xff] (!%p313_p2)  ;;  %v1922_v18 = vld [vmem:[%s2377_s1 + $0x10] sm:$0xff] (!%p313_p2)  ;;  %v1934_v21 = vld [vmem:[%s2377_s1 + $0x18] sm:$0xff] (!%p313_p2)  ;;  %vm645_vm8 = vcmask (!%p313_p2), 588800  }
   0x7   : > { %s1740_s21 = smov (!%p313_p2), 15   ;;  %s1741_s22 = smov (!%p313_p2), 1   ;;  %1703 = vset.pattern.permute.xlu0 (!%p313_p2), %v1746_v5  ;;  %1704 = vset.pattern.permute.xlu1 (!%p313_p2), %v1746_v5  ;;  %v1902_v8 = vshrl.u32 (!%p313_p2), %v372_v7, 7  ;;  %v1904_v11 = vand.u32 (!%p313_p2), 127, %v372_v7  ;;  %vm1146_vm9 = vcmask (!%p313_p2), 130048   ;;  %vm1335_vm10 = vcmask (!%p313_p2), 64512  }
   0x8   : > { %s1742_s23 = smov (!%p313_p2), 127   ;;  %s1743_s24 = smov (!%p313_p2), 113  }
   0x9   : > { %s1744_s25 = smov (!%p313_p2), 112   ;;  %s1747_s26 = smov (!%p313_p2), 111   ;;  %v374_v12 = vsub.s32 (!%p313_p2), 0, %v1902_v8  ;;  %v390_v13 = vsub.s32 (!%p313_p2), 1, %v1902_v8  ;;  %vm510_vm0 = vcmp.lt.s32.totalorder (!%p313_p2), %v1904_v11, 17  ;;  %vm527_vm1 = vcmp.lt.s32.totalorder (!%p313_p2), %v1904_v11, 16 }
   0xa   : > { %v406_v54 = vsub.s32 (!%p313_p2), 2, %v1902_v8  ;;  %v422_v55 = vsub.s32 (!%p313_p2), 3, %v1902_v8  ;;  %vm544_vm2 = vcmp.lt.s32.totalorder (!%p313_p2), %v1904_v11, 15  ;;  %vm561_vm3 = vcmp.lt.s32.totalorder (!%p313_p2), %v1904_v11, 1 }
   0xb   : > { %v1926_v19 = vrot.slane (!%p313_p2), %v1911_v14, %v374_v12  ;;  %v1929_v20 = vrot.slane (!%p313_p2), %v1911_v14, %v390_v13  ;;  %v1939_v23 = vrot.slane (!%p313_p2), %v1917_v17, %v374_v12  ;;  %v1942_v24 = vrot.slane (!%p313_p2), %v1922_v18, %v374_v12 }
   0xc   : > { %v1945_v27 = vrot.slane (!%p313_p2), %v1917_v17, %v390_v13  ;;  %v1952_v30 = vrot.slane (!%p313_p2), %v1922_v18, %v390_v13  ;;  %v1955_v31 = vrot.slane (!%p313_p2), %v1934_v21, %v374_v12  ;;  %v1962_v35 = vrot.slane (!%p313_p2), %v1934_v21, %v390_v13 }
   0xd   : > { %s2388_s14 = smov (!%p350_p3, %s1588_s14), 1  ;;  %v1982_v58 = vrot.slane %v1911_v14, %v406_v54  ;;  %v1985_v59 = vrot.slane %v1911_v14, %v422_v55  ;;  %v1991_v61 = vrot.slane %v1917_v17, %v406_v54  ;;  %v1994_v62 = vrot.slane %v1922_v18, %v406_v54 }
   0xe   : > { %s1611_s15 = sshll.u32 %s2388_s14, 5  ;;  %v1997_v63 = vrot.slane %v1934_v21, %v406_v54  ;;  %v2007_v12 = vrot.slane %v1922_v18, %v422_v55  ;;  %vm578_vm4 = vcmp.lt.s32.totalorder %v1904_v11, 127  ;;  %vm612_vm5 = vcmp.lt.s32.totalorder %v1904_v11, 112 }
   0xf   : > { %s1819_s18 = scalar_lea.vmem %s2376_s0, %s1611_s15  ;;  %vm595_vm6 = vcmp.lt.s32.totalorder %v1904_v11, 113  ;;  %vm629_vm7 = vcmp.lt.s32.totalorder %v1904_v11, 111  ;;  %s359_s28 = scalar_lea.vmem %s2386_s10, %s1611_s15 }
  0x10   : > { %v1822_v0 = vld [vmem:[%s1819_s18 + $0x10] sm:$0xff]  ;;  %v1825_v1 = vld [vmem:[%s1819_s18] sm:$0xff]  ;;  %v1832_v2 = vld [vmem:[%s1819_s18 + $0x18] sm:$0xff] }
  0x11   : > { %504 = vrot.lane.b32.xlu1 %v1822_v0, %s1738_s19  ;;  %500 = vrot.lane.b32.xlu0 %v1825_v1, %s1738_s19  ;;  %v1835_v3 = vld [vmem:[%s1819_s18 + $0x8] sm:$0xff] }
  0x15   : > { %506 = vrot.lane.b32.xlu1 %v1832_v2, %s1738_s19  ;;  %502 = vrot.lane.b32.xlu0 %v1835_v3, %s1738_s19 }
  0x19   : > { %521 = vrot.lane.b32.xlu1 %v1835_v3, %s1739_s20  ;;  %519 = vrot.lane.b32.xlu0 %v1825_v1, %s1739_s20 }
  0x1d   : > { %525 = vrot.lane.b32.xlu1 %v1832_v2, %s1739_s20  ;;  %523 = vrot.lane.b32.xlu0 %v1822_v0, %s1739_s20 }
  0x21   : > { %538 = vrot.lane.b32.xlu1 %v1835_v3, %s1740_s21  ;;  %536 = vrot.lane.b32.xlu0 %v1825_v1, %s1740_s21 }
  0x25   : > { %542 = vrot.lane.b32.xlu1 %v1832_v2, %s1740_s21  ;;  %540 = vrot.lane.b32.xlu0 %v1822_v0, %s1740_s21 }
  0x29   : > { %555 = vrot.lane.b32.xlu1 %v1835_v3, %s1741_s22  ;;  %553 = vrot.lane.b32.xlu0 %v1825_v1, %s1741_s22 }
  0x2d   : > { %559 = vrot.lane.b32.xlu1 %v1832_v2, %s1741_s22  ;;  %557 = vrot.lane.b32.xlu0 %v1822_v0, %s1741_s22 }
  0x31   : > { %572 = vrot.lane.b32.xlu1 %v1835_v3, %s1742_s23  ;;  %570 = vrot.lane.b32.xlu0 %v1825_v1, %s1742_s23 }
  0x35   : > { %576 = vrot.lane.b32.xlu1 %v1832_v2, %s1742_s23  ;;  %574 = vrot.lane.b32.xlu0 %v1822_v0, %s1742_s23 }
  0x39   : > { %589 = vrot.lane.b32.xlu1 %v1835_v3, %s1743_s24  ;;  %587 = vrot.lane.b32.xlu0 %v1825_v1, %s1743_s24 }
  0x3d   : > { %593 = vrot.lane.b32.xlu1 %v1832_v2, %s1743_s24  ;;  %591 = vrot.lane.b32.xlu0 %v1822_v0, %s1743_s24 }
  0x41   : > { %606 = vrot.lane.b32.xlu1 %v1835_v3, %s1744_s25  ;;  %604 = vrot.lane.b32.xlu0 %v1825_v1, %s1744_s25 }
  0x45   : > { %610 = vrot.lane.b32.xlu1 %v1832_v2, %s1744_s25  ;;  %608 = vrot.lane.b32.xlu0 %v1822_v0, %s1744_s25 }
  0x49   : > { %623 = vrot.lane.b32.xlu1 %v1835_v3, %s1747_s26  ;;  %621 = vrot.lane.b32.xlu0 %v1825_v1, %s1747_s26 }
  0x4d   : > { %627 = vrot.lane.b32.xlu1 %v1832_v2, %s1747_s26  ;;  %625 = vrot.lane.b32.xlu0 %v1822_v0, %s1747_s26 }
  0x51   : > { %642 = vperm.xlu0 %1703, %v639_v6  }
  0x83   : > { %v505_v9 = vpop.permute.xlu1 %504  ;;  %v501_v10 = vpop.permute.xlu0 %500 }
  0x87   : > { %v507_v15 = vpop.permute.xlu1 %506  ;;  %v503_v16 = vpop.permute.xlu0 %502 }
  0x88   : > { %v513_v22 = vsel %vm510_vm0, %v501_v10, %v503_v16  ;;  %v514_v28 = vsel %vm510_vm0, %v507_v15, %v501_v10  ;;  %v512_v32 = vsel %vm510_vm0, %v503_v16, %v505_v9  ;;  %v511_v36 = vsel %vm510_vm0, %v505_v9, %v507_v15 }
  0x89   : > { %v516_v33 = vmul.f32 %v513_v22, %v1926_v19  ;;  %v515_v37 = vmul.f32 %v514_v28, %v1939_v23  ;;  %v517_v41 = vmul.f32 %v512_v32, %v1942_v24  ;;  %v518_v47 = vmul.f32 %v511_v36, %v1955_v31 }
  0x8a   : > { %v2004_v10 = vrot.slane %v1917_v17, %v422_v55  ;;  %v2014_v22 = vrot.slane %v1934_v21, %v422_v55 }
  0x8b   : > { %v522_v25 = vpop.permute.xlu1 %521  ;;  %v520_v26 = vpop.permute.xlu0 %519 }
  0x8c   : > { %v530_v29 = vsel %vm527_vm1, %v520_v26, %v522_v25 }
  0x8d   : > { %v533_v34 = vmul.f32 %v530_v29, %v1929_v20 }
  0x8f   : > { %v526_v38 = vpop.permute.xlu1 %525  ;;  %v524_v39 = vpop.permute.xlu0 %523  ;;  %v1613_v40 = vpack.c.bf16 %v533_v34, %v516_v33  ;;  %v438_v33 = vsub.s32 5, %v1902_v8 }
  0x90   : > { %v531_v42 = vsel %vm527_vm1, %v526_v38, %v520_v26  ;;  %v528_v43 = vsel %vm527_vm1, %v524_v39, %v526_v38  ;;  %v529_v44 = vsel %vm527_vm1, %v522_v25, %v524_v39 }
  0x91   : > { %v532_v45 = vmul.f32 %v531_v42, %v1945_v27  ;;  %v534_v46 = vmul.f32 %v529_v44, %v1952_v30  ;;  %1614 = vmatprep.subr.bf16.mxu0 %v1613_v40  ;;  %v535_v48 = vmul.f32 %v528_v43, %v1962_v35 }
  0x93   : > { %v539_v49 = vpop.permute.xlu1 %538  ;;  %v537_v50 = vpop.permute.xlu0 %536  ;;  %v1615_v51 = vpack.c.bf16 %v532_v45, %v515_v37  ;;  %v1629_v52 = vpack.c.bf16 %v535_v48, %v518_v47  ;;  %v1631_v53 = vpack.c.bf16 %v534_v46, %v517_v41  ;;  %v2033_v48 = vrot.slane %v1917_v17, %v438_v33 }
  0x94   : > { %v547_v60 = vsel %vm544_vm2, %v537_v50, %v539_v49 }
  0x95   : > { %1616 = vmatpush1.bf16.msra.mxu0 %v1615_v51  ;;  %1630 = vmatprep.subr.bf16.mxu1 %v1629_v52  ;;  %v550_v13 = vmul.f32 %v547_v60, %v1982_v58  ;;  %v2041_v51 = vrot.slane %v1911_v14, %v438_v33  ;;  %v2044_v52 = vrot.slane %v1922_v18, %v438_v33 }
  0x96   : > { %1632 = vmatpush1.bf16.msra.mxu1 %v1631_v53 }
  0x97   : > { %v543_v56 = vpop.permute.xlu1 %542  ;;  %v541_v57 = vpop.permute.xlu0 %540 }
  0x98   : > { %v548_v7 = vsel %vm544_vm2, %v543_v56, %v537_v50  ;;  %v546_v15 = vsel %vm544_vm2, %v539_v49, %v541_v57  ;;  %v545_v25 = vsel %vm544_vm2, %v541_v57, %v543_v56  ;;  %v2036_v49 = vrot.slane %v1934_v21, %v438_v33 }
  0x99   : > { %v549_v26 = vmul.f32 %v548_v7, %v1991_v61  ;;  %v551_v34 = vmul.f32 %v546_v15, %v1994_v62  ;;  %v552_v39 = vmul.f32 %v545_v25, %v1997_v63  ;;  %v454_v33 = vsub.s32 6, %v1902_v8 }
  0x9b   : > { %v556_v5 = vpop.permute.xlu1 %555  ;;  %v554_v6 = vpop.permute.xlu0 %553 }
  0x9c   : > { %v564_v9 = vsel %vm561_vm3, %v554_v6, %v556_v5 }
  0x9d   : > { %v567_v16 = vmul.f32 %v564_v9, %v1985_v59 }
  0x9f   : > { %v560_v28 = vpop.permute.xlu1 %559  ;;  %v558_v29 = vpop.permute.xlu0 %557  ;;  %v1617_v32 = vpack.c.bf16 %v567_v16, %v550_v13 }
  0xa0   : > { %v565_v36 = vsel %vm561_vm3, %v560_v28, %v554_v6  ;;  %v562_v37 = vsel %vm561_vm3, %v558_v29, %v560_v28  ;;  %v563_v38 = vsel %vm561_vm3, %v556_v5, %v558_v29 }
  0xa1   : > { %v566_v40 = vmul.f32 %v565_v36, %v2004_v10  ;;  %v568_v41 = vmul.f32 %v563_v38, %v2007_v12  ;;  %v569_v42 = vmul.f32 %v562_v37, %v2014_v22  ;;  %1618 = vmatprep.subr.bf16.mxu0 %v1617_v32  ;;  %v470_v32 = vsub.s32 7, %v1902_v8 }
  0xa3   : > { %v573_v43 = vpop.permute.xlu1 %572  ;;  %v571_v44 = vpop.permute.xlu0 %570  ;;  %v1619_v45 = vpack.c.bf16 %v566_v40, %v549_v26  ;;  %v1633_v46 = vpack.c.bf16 %v569_v42, %v552_v39  ;;  %v1635_v47 = vpack.c.bf16 %v568_v41, %v551_v34  ;;  %v2065_v34 = vrot.slane %v1934_v21, %v454_v33 }
  0xa4   : > { %v581_v50 = vsel %vm578_vm4, %v571_v44, %v573_v43  ;;  %v2073_v39 = vrot.slane %v1922_v18, %v454_v33  ;;  %v2078_v40 = vrot.slane %v1917_v17, %v470_v32  ;;  %v2083_v42 = vrot.slane %v1934_v21, %v470_v32 }
  0xa5   : > { %1620 = vmatpush1.bf16.msra.mxu0 %v1619_v45  ;;  %1634 = vmatprep.subr.bf16.mxu1 %v1633_v46  ;;  %v583_v55 = vmul.f32 %v581_v50, %v2033_v48  ;;  %v2092_v45 = vrot.slane %v1917_v17, %v454_v33 }
  0xa6   : > { %1636 = vmatpush1.bf16.msra.mxu1 %v1635_v47 }
  0xa7   : > { %v577_v53 = vpop.permute.xlu1 %576  ;;  %v575_v54 = vpop.permute.xlu0 %574  ;;  %v1623_v26 = vpack.c.bf16 %v583_v55, %v1825_v1 }
  0xa8   : > { %v582_v56 = vsel %vm578_vm4, %v577_v53, %v571_v44  ;;  %v579_v57 = vsel %vm578_vm4, %v575_v54, %v577_v53  ;;  %v580_v60 = vsel %vm578_vm4, %v573_v43, %v575_v54  ;;  %v2086_v43 = vrot.slane %v1911_v14, %v470_v32 }
  0xa9   : > { %v586_v5 = vmul.f32 %v582_v56, %v2036_v49  ;;  %v584_v6 = vmul.f32 %v580_v60, %v2041_v51  ;;  %v585_v7 = vmul.f32 %v579_v57, %v2044_v52  ;;  %v2089_v44 = vrot.slane %v1922_v18, %v470_v32  ;;  %v2131_v32 = vld [vmem:[%s2377_s1 + $0x20] ss:$0 sm:$0xff] }
  0xab   : > { %v590_v9 = vpop.permute.xlu1 %589  ;;  %v588_v13 = vpop.permute.xlu0 %587  ;;  %v1621_v15 = vpack.c.bf16 %v584_v6, %v1835_v3  ;;  %v1637_v16 = vpack.c.bf16 %v586_v5, %v1832_v2  ;;  %v1639_v25 = vpack.c.bf16 %v585_v7, %v1822_v0  ;;  %v2068_v0 = vrot.slane %v1911_v14, %v454_v33 }
  0xac   : > { %v598_v47 = vsel %vm595_vm6, %v588_v13, %v590_v9 }
  0xad   : > { %1622 = vmatprep.subr.bf16.mxu0 %v1621_v15  ;;  %1638 = vmatprep.subr.bf16.mxu1 %v1637_v16  ;;  %v600_v6 = vmul.f32 %v598_v47, %v2092_v45 }
  0xae   : > { %1624 = vmatpush1.bf16.msra.mxu0 %v1623_v26  ;;  %1640 = vmatpush1.bf16.msra.mxu1 %v1639_v25  ;;  %v2116_v26 = vld [vmem:[%s2377_s1 + $0x38] ss:$0 sm:$0xff] }
  0xaf   : > { %v594_v28 = vpop.permute.xlu1 %593  ;;  %v592_v29 = vpop.permute.xlu0 %591 }
  0xb0   : > { %v599_v38 = vsel %vm595_vm6, %v594_v28, %v588_v13  ;;  %v597_v8 = vsel %vm595_vm6, %v590_v9, %v592_v29  ;;  %v596_v46 = vsel %vm595_vm6, %v592_v29, %v594_v28  ;;  %v2121_v28 = vld [vmem:[%s2377_s1 + $0x28] ss:$0 sm:$0xff]  ;;  %v2126_v29 = vld [vmem:[%s2377_s1 + $0x30] ss:$0 sm:$0xff] }
  0xb1   : > { %v603_v50 = vmul.f32 %v599_v38, %v2065_v34  ;;  %v601_v21 = vmul.f32 %v597_v8, %v2068_v0  ;;  %v602_v56 = vmul.f32 %v596_v46, %v2073_v39 }
  0xb3   : > { %v607_v36 = vpop.permute.xlu1 %606  ;;  %v605_v37 = vpop.permute.xlu0 %604 }
  0xb4   : > { %v615_v41 = vsel %vm612_vm5, %v605_v37, %v607_v36 }
  0xb5   : > { %v617_v14 = vmul.f32 %v615_v41, %v2078_v40 }
  0xb7   : > { %v611_v53 = vpop.permute.xlu1 %610  ;;  %v609_v54 = vpop.permute.xlu0 %608  ;;  %v1627_v25 = vpack.c.bf16 %v617_v14, %v600_v6 }
  0xb8   : > { %v616_v18 = vsel %vm612_vm5, %v611_v53, %v605_v37  ;;  %v613_v17 = vsel %vm612_vm5, %v609_v54, %v611_v53  ;;  %v614_v55 = vsel %vm612_vm5, %v607_v36, %v609_v54  ;;  %v638_v53 = vld [vmem:[%s2378_s2] sm:$0xff] }
  0xb9   : > { %v620_v57 = vmul.f32 %v616_v18, %v2083_v42  ;;  %v618_v60 = vmul.f32 %v614_v55, %v2086_v43  ;;  %v619_v5 = vmul.f32 %v613_v17, %v2089_v44 }
  0xbb   : > { %v624_v7 = vpop.permute.xlu1 %623  ;;  %v622_v9 = vpop.permute.xlu0 %621  ;;  %v1625_v13 = vpack.c.bf16 %v618_v60, %v601_v21  ;;  %v1641_v15 = vpack.c.bf16 %v620_v57, %v603_v50  ;;  %v1643_v16 = vpack.c.bf16 %v619_v5, %v602_v56 }
  0xbc   : > { %v632_v33 = vsel %vm629_vm7, %v622_v9, %v624_v7 }
  0xbd   : > { %1626 = vmatprep.subr.bf16.mxu0 %v1625_v13  ;;  %1642 = vmatprep.subr.bf16.mxu1 %v1641_v15  ;;  %v634_v21 = vmul.f32 %v2131_v32, %v632_v33 }
  0xbe   : > { %1628 = vmatpush1.bf16.msra.mxu0 %v1627_v25  ;;  %1644 = vmatpush1.bf16.msra.mxu1 %v1643_v16 }
  0xbf   : > { %v628_v36 = vpop.permute.xlu1 %627  ;;  %v626_v37 = vpop.permute.xlu0 %625 }
  0xc0   : > { %v633_v38 = vsel %vm629_vm7, %v628_v36, %v622_v9  ;;  %v630_v8 = vsel %vm629_vm7, %v626_v37, %v628_v36  ;;  %v631_v41 = vsel %vm629_vm7, %v624_v7, %v626_v37 }
  0xc1   : > { %v637_v46 = vmul.f32 %v2116_v26, %v633_v38  ;;  %v635_v47 = vmul.f32 %v2121_v28, %v631_v41  ;;  %v636_v50 = vmul.f32 %v2126_v29, %v630_v8 }
  0xc3   : > { %665 = vmatprep.subr.mxu0 %v635_v47  ;;  %736 = vmatprep.subr.mxu1 %v637_v46 }
  0xc4   : > { %666 = vmatpush1.msra.mxu0 %v634_v21  ;;  %737 = vmatpush1.msra.mxu1 %v636_v50 }
  0xc5   : > { %1601 = vmatmul.mubr.msk.f32.vlgmr.msra.gmra.mrb[0].mxu0 %vm645_vm8, %v638_v53  ;;  %1602 = vmatmul.mubr.msk.f32.vlgmr.msra.gmra.mrb[0].mxu1 %vm645_vm8, %v638_v53 }
  0xc6   : > { %1029 = vmatprep.mubr.f32.mxu0 %v1745_v4  ;;  %1100 = vmatprep.mubr.f32.mxu1 %v1745_v4 }
  0xd0   : > { %v643_v54 = vpop.permute.xlu0 %642 }
 0x198   : > { %v715_v14 = vpop.f32.mrb[0].mxu0  ;;  %v786_v18 = vpop.f32.mrb[0].mxu1 }
 0x199   : > { %v717_v17 = vpop.f32.mrb[1].mxu0  ;;  %v788_v55 = vpop.f32.mrb[1].mxu1  ;;  %v787_v56 = vadd.f32 %v786_v18, %v643_v54  ;;  %v716_v57 = vadd.f32 %v715_v14, %v643_v54 }
 0x19a   : > { %v718_v60 = vadd.f32 %v717_v17, %v643_v54  ;;  %v789_v5 = vadd.f32 %v788_v55, %v643_v54 }
 0x19c   : > { %v807_v6 = vadd.f32 %v789_v5, %v787_v56  ;;  %v791_v7 = vadd.f32 %v718_v60, %v716_v57 }
 0x19e   : > { %808 = vadd.xlane.f32.xlu0 %v807_v6  ;;  %792 = vadd.xlane.f32.xlu1 %v791_v7 }
 0x22b   : > { %v809_v9 = vpop.xlane.xlu0 %808  ;;  %v793_v13 = vpop.xlane.xlu1 %792 }
 0x22c   : > { %v810_v15 = vmul.f32 0.00390625, %v809_v9  ;;  %v794_v16 = vmul.f32 0.00390625, %v793_v13 }
 0x22e   : > { %v811_v25 = vsub.f32 %v787_v56, %v810_v15  ;;  %v812_v33 = vsub.f32 %v789_v5, %v810_v15  ;;  %v795_v36 = vsub.f32 %v716_v57, %v794_v16  ;;  %v796_v37 = vsub.f32 %v718_v60, %v794_v16  ;;  %v956_v16 = vld [vmem:[%s2381_s5] sm:$0xff] }
 0x230   : > { %v813_v38 = vmul.f32 %v811_v25, %v811_v25  ;;  %v814_v8 = vmul.f32 %v812_v33, %v812_v33  ;;  %v797_v41 = vmul.f32 %v795_v36, %v795_v36  ;;  %v798_v46 = vmul.f32 %v796_v37, %v796_v37 }
 0x232   : > { %v815_v47 = vadd.f32 %v814_v8, %v813_v38  ;;  %v799_v50 = vadd.f32 %v798_v46, %v797_v41 }
 0x234   : > { %816 = vadd.xlane.f32.xlu0 %v815_v47  ;;  %800 = vadd.xlane.f32.xlu1 %v799_v50 }
 0x2c1   : > { %v817_v21 = vpop.xlane.xlu0 %816  ;;  %v801_v53 = vpop.xlane.xlu1 %800 }
 0x2c2   : > { %v818_v54 = vmul.f32 0.00390625, %v817_v21  ;;  %v802_v14 = vmul.f32 0.00390625, %v801_v53 }
 0x2c4   : > { %v819_v18 = vadd.f32 1e-05, %v818_v54  ;;  %v803_v17 = vadd.f32 1e-05, %v802_v14 }
 0x2c6   : > { %1705 = vrsqrt.f32 %v819_v18 }
 0x2c7   : > { %1707 = vrsqrt.f32 %v803_v17 }
 0x2d0   : > { %v1706_v55 = vpop.eup %1705 }
 0x2d1   : > { %v1708_v56 = vpop.eup %1707  ;;  %v821_v5 = vmul.f32 %v1706_v55, %v811_v25  ;;  %v822_v9 = vmul.f32 %v1706_v55, %v812_v33 }
 0x2d2   : > { %v805_v57 = vmul.f32 %v1708_v56, %v795_v36  ;;  %v806_v60 = vmul.f32 %v1708_v56, %v796_v37 }
 0x2d3   : > { %v2160_v13 = vmax.f32 %v821_v5, 0.0  ;;  %v2166_v15 = vmax.f32 %v822_v9, 0.0 }
 0x2d4   : > { %v2152_v6 = vmax.f32 %v805_v57, 0.0  ;;  %v2154_v7 = vmax.f32 %v806_v60, 0.0 }
 0x2d6   : > { %829 = vrot.lane.b32.xlu0 %v2154_v7, %s1738_s19  ;;  %827 = vrot.lane.b32.xlu1 %v2152_v6, %s1738_s19 }
 0x2da   : > { %843 = vrot.lane.b32.xlu0 %v2152_v6, %s1739_s20  ;;  %831 = vrot.lane.b32.xlu1 %v2160_v13, %s1738_s19 }
 0x2de   : > { %847 = vrot.lane.b32.xlu0 %v2160_v13, %s1739_s20  ;;  %833 = vrot.lane.b32.xlu1 %v2166_v15, %s1738_s19 }
 0x2e2   : > { %859 = vrot.lane.b32.xlu0 %v2152_v6, %s1740_s21  ;;  %845 = vrot.lane.b32.xlu1 %v2154_v7, %s1739_s20 }
 0x2e6   : > { %863 = vrot.lane.b32.xlu0 %v2160_v13, %s1740_s21  ;;  %849 = vrot.lane.b32.xlu1 %v2166_v15, %s1739_s20 }
 0x2ea   : > { %875 = vrot.lane.b32.xlu0 %v2152_v6, %s1741_s22  ;;  %861 = vrot.lane.b32.xlu1 %v2154_v7, %s1740_s21 }
 0x2ee   : > { %879 = vrot.lane.b32.xlu0 %v2160_v13, %s1741_s22  ;;  %865 = vrot.lane.b32.xlu1 %v2166_v15, %s1740_s21 }
 0x2f2   : > { %891 = vrot.lane.b32.xlu0 %v2152_v6, %s1742_s23  ;;  %877 = vrot.lane.b32.xlu1 %v2154_v7, %s1741_s22 }
 0x2f6   : > { %895 = vrot.lane.b32.xlu0 %v2160_v13, %s1742_s23  ;;  %881 = vrot.lane.b32.xlu1 %v2166_v15, %s1741_s22 }
 0x2fa   : > { %907 = vrot.lane.b32.xlu0 %v2152_v6, %s1743_s24  ;;  %893 = vrot.lane.b32.xlu1 %v2154_v7, %s1742_s23 }
 0x2fe   : > { %911 = vrot.lane.b32.xlu0 %v2160_v13, %s1743_s24  ;;  %897 = vrot.lane.b32.xlu1 %v2166_v15, %s1742_s23 }
 0x302   : > { %923 = vrot.lane.b32.xlu0 %v2152_v6, %s1744_s25  ;;  %909 = vrot.lane.b32.xlu1 %v2154_v7, %s1743_s24 }
 0x306   : > { %927 = vrot.lane.b32.xlu0 %v2160_v13, %s1744_s25  ;;  %913 = vrot.lane.b32.xlu1 %v2166_v15, %s1743_s24 }
 0x30a   : > { %939 = vrot.lane.b32.xlu0 %v2152_v6, %s1747_s26  ;;  %925 = vrot.lane.b32.xlu1 %v2154_v7, %s1744_s25 }
 0x30e   : > { %943 = vrot.lane.b32.xlu0 %v2160_v13, %s1747_s26  ;;  %929 = vrot.lane.b32.xlu1 %v2166_v15, %s1744_s25 }
 0x312   : > { %959 = vperm.xlu0 %1703, %v956_v16   ;;  %941 = vrot.lane.b32.xlu1 %v2154_v7, %s1747_s26 }
 0x316   : > { %945 = vrot.lane.b32.xlu1 %v2166_v15, %s1747_s26 }
 0x348   : > { %v830_v25 = vpop.permute.xlu0 %829  ;;  %v828_v33 = vpop.permute.xlu1 %827 }
 0x349   : > { %v837_v41 = vsel %vm510_vm0, %v828_v33, %v830_v25 }
 0x34a   : > { %v840_v21 = vmul.f32 %v837_v41, %v1926_v19 }
 0x34c   : > { %v844_v36 = vpop.permute.xlu0 %843  ;;  %v832_v37 = vpop.permute.xlu1 %831 }
 0x34d   : > { %v836_v17 = vsel %vm510_vm0, %v830_v25, %v832_v37 }
 0x34e   : > { %v841_v25 = vmul.f32 %v836_v17, %v1942_v24 }
 0x350   : > { %v848_v38 = vpop.permute.xlu0 %847  ;;  %v834_v8 = vpop.permute.xlu1 %833 }
 0x351   : > { %v835_v14 = vsel %vm510_vm0, %v832_v37, %v834_v8  ;;  %v838_v18 = vsel %vm510_vm0, %v834_v8, %v828_v33 }
 0x352   : > { %v839_v5 = vmul.f32 %v838_v18, %v1939_v23  ;;  %v842_v9 = vmul.f32 %v835_v14, %v1955_v31 }
 0x354   : > { %v860_v46 = vpop.permute.xlu0 %859  ;;  %v846_v47 = vpop.permute.xlu1 %845 }
 0x355   : > { %v853_v50 = vsel %vm527_vm1, %v844_v36, %v846_v47  ;;  %v852_v53 = vsel %vm527_vm1, %v846_v47, %v848_v38 }
 0x356   : > { %v856_v54 = vmul.f32 %v853_v50, %v1929_v20  ;;  %v857_v60 = vmul.f32 %v852_v53, %v1952_v30 }
 0x358   : > { %v864_v55 = vpop.permute.xlu0 %863  ;;  %v850_v56 = vpop.permute.xlu1 %849  ;;  %v1645_v57 = vpack.c.bf16 %v856_v54, %v840_v21  ;;  %v1663_v47 = vpack.c.bf16 %v857_v60, %v841_v25 }
 0x359   : > { %v851_v19 = vsel %vm527_vm1, %v848_v38, %v850_v56  ;;  %v854_v20 = vsel %vm527_vm1, %v850_v56, %v844_v36 }
 0x35a   : > { %v855_v16 = vmul.f32 %v854_v20, %v1945_v27  ;;  %v858_v33 = vmul.f32 %v851_v19, %v1962_v35  ;;  %1646 = vmatprep.subr.bf16.mxu0 %v1645_v57 }
 0x35c   : > { %v1647_v37 = vpack.c.bf16 %v855_v16, %v839_v5  ;;  %v876_v8 = vpop.permute.xlu0 %875  ;;  %v862_v30 = vpop.permute.xlu1 %861  ;;  %v1661_v41 = vpack.c.bf16 %v858_v33, %v842_v9 }
 0x35d   : > { %v869_v23 = vsel %vm544_vm2, %v860_v46, %v862_v30  ;;  %v868_v14 = vsel %vm544_vm2, %v862_v30, %v864_v55 }
 0x35e   : > { %1648 = vmatpush1.bf16.msra.mxu0 %v1647_v37  ;;  %1662 = vmatprep.subr.bf16.mxu1 %v1661_v41  ;;  %v872_v24 = vmul.f32 %v869_v23, %v1982_v58 }
 0x35f   : > { %1664 = vmatpush1.bf16.msra.mxu1 %v1663_v47 }
 0x360   : > { %v880_v36 = vpop.permute.xlu0 %879  ;;  %v866_v38 = vpop.permute.xlu1 %865 }
 0x361   : > { %v867_v53 = vsel %vm544_vm2, %v864_v55, %v866_v38  ;;  %v870_v54 = vsel %vm544_vm2, %v866_v38, %v860_v46  ;;  %v873_v55 = vmul.f32 %v868_v14, %v1994_v62 }
 0x362   : > { %v871_v60 = vmul.f32 %v870_v54, %v1991_v61  ;;  %v874_v19 = vmul.f32 %v867_v53, %v1997_v63 }
 0x364   : > { %v892_v31 = vpop.permute.xlu0 %891  ;;  %v878_v27 = vpop.permute.xlu1 %877 }
 0x365   : > { %v885_v35 = vsel %vm561_vm3, %v876_v8, %v878_v27  ;;  %v884_v50 = vsel %vm561_vm3, %v878_v27, %v880_v36 }
 0x366   : > { %v888_v21 = vmul.f32 %v885_v35, %v1985_v59  ;;  %v889_v57 = vmul.f32 %v884_v50, %v2007_v12 }
 0x368   : > { %v896_v18 = vpop.permute.xlu0 %895  ;;  %v882_v17 = vpop.permute.xlu1 %881  ;;  %v1649_v56 = vpack.c.bf16 %v888_v21, %v872_v24  ;;  %v1667_v33 = vpack.c.bf16 %v889_v57, %v873_v55 }
 0x369   : > { %v883_v58 = vsel %vm561_vm3, %v880_v36, %v882_v17  ;;  %v886_v59 = vsel %vm561_vm3, %v882_v17, %v876_v8 }
 0x36a   : > { %v887_v46 = vmul.f32 %v886_v59, %v2004_v10  ;;  %v890_v20 = vmul.f32 %v883_v58, %v2014_v22  ;;  %1650 = vmatprep.subr.bf16.mxu0 %v1649_v56 }
 0x36c   : > { %v1651_v5 = vpack.c.bf16 %v887_v46, %v871_v60  ;;  %v908_v9 = vpop.permute.xlu0 %907  ;;  %v894_v12 = vpop.permute.xlu1 %893  ;;  %v1665_v16 = vpack.c.bf16 %v890_v20, %v874_v19 }
 0x36d   : > { %v900_v25 = vsel %vm578_vm4, %v894_v12, %v896_v18  ;;  %v901_v61 = vsel %vm578_vm4, %v892_v31, %v894_v12 }
 0x36e   : > { %v903_v63 = vmul.f32 %v901_v61, %v2033_v48  ;;  %v904_v10 = vmul.f32 %v900_v25, %v2041_v51  ;;  %1652 = vmatpush1.bf16.msra.mxu0 %v1651_v5  ;;  %1666 = vmatprep.subr.bf16.mxu1 %v1665_v16 }
 0x36f   : > { %1668 = vmatpush1.bf16.msra.mxu1 %v1667_v33 }
 0x370   : > { %v1655_v62 = vpack.c.bf16 %v903_v63, %v2152_v6  ;;  %v912_v22 = vpop.permute.xlu0 %911  ;;  %v898_v37 = vpop.permute.xlu1 %897  ;;  %v1653_v8 = vpack.c.bf16 %v904_v10, %v2154_v7 }
 0x371   : > { %v899_v30 = vsel %vm578_vm4, %v896_v18, %v898_v37  ;;  %v902_v41 = vsel %vm578_vm4, %v898_v37, %v892_v31 }
 0x372   : > { %v905_v47 = vmul.f32 %v899_v30, %v2044_v52  ;;  %v906_v48 = vmul.f32 %v902_v41, %v2036_v49  ;;  %1654 = vmatprep.subr.bf16.mxu0 %v1653_v8 }
 0x373   : > { %1656 = vmatpush1.bf16.msra.mxu0 %v1655_v62 }
 0x374   : > { %v1671_v51 = vpack.c.bf16 %v905_v47, %v2160_v13  ;;  %v924_v36 = vpop.permute.xlu0 %923  ;;  %v910_v6 = vpop.permute.xlu1 %909  ;;  %v1669_v38 = vpack.c.bf16 %v906_v48, %v2166_v15 }
 0x375   : > { %v916_v27 = vsel %vm595_vm6, %v910_v6, %v912_v22  ;;  %v917_v52 = vsel %vm595_vm6, %v908_v9, %v910_v6 }
 0x376   : > { %1670 = vmatprep.subr.bf16.mxu1 %v1669_v38  ;;  %v919_v35 = vmul.f32 %v917_v52, %v2092_v45  ;;  %v920_v15 = vmul.f32 %v916_v27, %v2068_v0  ;;  %v1140_v27 = vld [vmem:[%s2383_s7] sm:$0xff] }
 0x377   : > { %1672 = vmatpush1.bf16.msra.mxu1 %v1671_v51 }
 0x378   : > { %v928_v7 = vpop.permute.xlu0 %927  ;;  %v914_v23 = vpop.permute.xlu1 %913 }
 0x379   : > { %v915_v53 = vsel %vm595_vm6, %v912_v22, %v914_v23  ;;  %v918_v54 = vsel %vm595_vm6, %v914_v23, %v908_v9 }
 0x37a   : > { %v921_v45 = vmul.f32 %v915_v53, %v2073_v39 }
 0x37c   : > { %v926_v31 = vpop.permute.xlu1 %925  ;;  %v940_v24 = vpop.permute.xlu0 %939 }
 0x37d   : > { %v932_v49 = vsel %vm612_vm5, %v926_v31, %v928_v7  ;;  %v933_v13 = vsel %vm612_vm5, %v924_v36, %v926_v31 }
 0x37e   : > { %v935_v50 = vmul.f32 %v933_v13, %v2078_v40  ;;  %v936_v21 = vmul.f32 %v932_v49, %v2086_v43  ;;  %v922_v40 = vmul.f32 %v918_v54, %v2065_v34 }
 0x380   : > { %v1659_v14 = vpack.c.bf16 %v935_v50, %v919_v35  ;;  %v930_v18 = vpop.permute.xlu1 %929  ;;  %v1657_v17 = vpack.c.bf16 %v936_v21, %v920_v15  ;;  %v944_v58 = vpop.permute.xlu0 %943 }
 0x381   : > { %v931_v56 = vsel %vm612_vm5, %v928_v7, %v930_v18  ;;  %v934_v0 = vsel %vm612_vm5, %v930_v18, %v924_v36 }
 0x382   : > { %v937_v43 = vmul.f32 %v931_v56, %v2089_v44  ;;  %v938_v57 = vmul.f32 %v934_v0, %v2083_v42  ;;  %1658 = vmatprep.subr.bf16.mxu0 %v1657_v17  ;;  %v955_v42 = vld [vmem:[%s2380_s4] sm:$0xff] }
 0x383   : > { %1660 = vmatpush1.bf16.msra.mxu0 %v1659_v14  ;;  %v1139_v56 = vld [vmem:[%s2382_s6] sm:$0xff] }
 0x384   : > { %v1675_v59 = vpack.c.bf16 %v937_v43, %v921_v45  ;;  %v942_v60 = vpop.permute.xlu1 %941  ;;  %v1673_v19 = vpack.c.bf16 %v938_v57, %v922_v40  ;;  %v1729_v45 = vld [vmem:[%s1819_s18 + $0x10] sm:$0xff] }
 0x385   : > { %v948_v46 = vsel %vm629_vm7, %v942_v60, %v944_v58  ;;  %v949_v20 = vsel %vm629_vm7, %v940_v24, %v942_v60 }
 0x386   : > { %v951_v39 = vmul.f32 %v2131_v32, %v949_v20  ;;  %v952_v34 = vmul.f32 %v2121_v28, %v948_v46  ;;  %1674 = vmatprep.subr.bf16.mxu1 %v1673_v19 }
 0x387   : > { %1676 = vmatpush1.bf16.msra.mxu1 %v1675_v59 }
 0x388   : > { %981 = vmatprep.subr.mxu0 %v952_v34  ;;  %v946_v44 = vpop.permute.xlu1 %945 }
 0x389   : > { %v947_v55 = vsel %vm629_vm7, %v944_v58, %v946_v44  ;;  %v950_v5 = vsel %vm629_vm7, %v946_v44, %v940_v24  ;;  %982 = vmatpush1.msra.mxu0 %v951_v39 }
 0x38a   : > { %v953_v9 = vmul.f32 %v2126_v29, %v947_v55  ;;  %v954_v32 = vmul.f32 %v2116_v26, %v950_v5  ;;  %1603 = vmatmul.mubr.msk.f32.vlgmr.msra.gmra.mrb[2].mxu0 %vm645_vm8, %v955_v42 }
 0x38b   : > { %1214 = vmatprep.mubr.f32.mxu0 %v1745_v4 }
 0x38c   : > { %1052 = vmatprep.subr.mxu1 %v954_v32 }
 0x38d   : > { %1053 = vmatpush1.msra.mxu1 %v953_v9 }
 0x38e   : > { %1604 = vmatmul.mubr.msk.f32.vlgmr.msra.gmra.mrb[2].mxu1 %vm645_vm8, %v955_v42 }
 0x38f   : > { %1285 = vmatprep.mubr.f32.mxu1 %v1745_v4 }
 0x391   : > { %v960_v28 = vpop.permute.xlu0 %959 }
 0x45d   : > { %v1031_v12 = vpop.f32.mrb[2].mxu0 }
 0x45e   : > { %v1032_v16 = vadd.f32 %v1031_v12, %v960_v28  ;;  %v1033_v11 = vpop.f32.mrb[3].mxu0 }
 0x45f   : > { %v1034_v33 = vadd.f32 %v1033_v11, %v960_v28 }
 0x461   : > { %v1102_v25 = vpop.f32.mrb[2].mxu1  ;;  %v1107_v61 = vadd.f32 %v1034_v33, %v1032_v16 }
 0x462   : > { %v1103_v29 = vadd.f32 %v1102_v25, %v960_v28  ;;  %v1104_v63 = vpop.f32.mrb[3].mxu1  ;;  %v1329_v25 = vld [vmem:[%s2385_s9] sm:$0xff] }
 0x463   : > { %v1105_v26 = vadd.f32 %v1104_v63, %v960_v28  ;;  %1108 = vadd.xlane.f32.xlu1 %v1107_v61 }
 0x465   : > { %v1123_v10 = vadd.f32 %v1105_v26, %v1103_v29 }
 0x467   : > { %1124 = vadd.xlane.f32.xlu0 %v1123_v10 }
 0x4f0   : > { %v1109_v62 = vpop.xlane.xlu1 %1108 }
 0x4f1   : > { %v1110_v22 = vmul.f32 0.00390625, %v1109_v62 }
 0x4f3   : > { %v1111_v37 = vsub.f32 %v1032_v16, %v1110_v22  ;;  %v1112_v8 = vsub.f32 %v1034_v33, %v1110_v22 }
 0x4f4   : > { %v1125_v30 = vpop.xlane.xlu0 %1124 }
 0x4f5   : > { %v1126_v41 = vmul.f32 0.00390625, %v1125_v30  ;;  %v1113_v47 = vmul.f32 %v1111_v37, %v1111_v37  ;;  %v1114_v48 = vmul.f32 %v1112_v8, %v1112_v8 }
 0x4f7   : > { %v1127_v51 = vsub.f32 %v1103_v29, %v1126_v41  ;;  %v1128_v36 = vsub.f32 %v1105_v26, %v1126_v41  ;;  %v1115_v6 = vadd.f32 %v1114_v48, %v1113_v47  ;;  %v1328_v48 = vld [vmem:[%s2384_s8] sm:$0xff] }
 0x4f9   : > { %1116 = vadd.xlane.f32.xlu0 %v1115_v6  ;;  %v1129_v38 = vmul.f32 %v1127_v51, %v1127_v51  ;;  %v1130_v7 = vmul.f32 %v1128_v36, %v1128_v36 }
 0x4fb   : > { %v1131_v23 = vadd.f32 %v1130_v7, %v1129_v38 }
 0x4fd   : > { %1132 = vadd.xlane.f32.xlu1 %v1131_v23 }
 0x50f   : > { %1143 = vperm.xlu0 %1703, %v1140_v27  }
 0x586   : > { %v1117_v52 = vpop.xlane.xlu0 %1116 }
 0x587   : > { %v1118_v31 = vmul.f32 0.00390625, %v1117_v52 }
 0x589   : > { %v1119_v49 = vadd.f32 1e-05, %v1118_v31 }
 0x58a   : > { %v1133_v13 = vpop.xlane.xlu1 %1132 }
 0x58b   : > { %1709 = vrsqrt.f32 %v1119_v49  ;;  %v1134_v35 = vmul.f32 0.00390625, %v1133_v13 }
 0x58d   : > { %v1135_v15 = vadd.f32 1e-05, %v1134_v35 }
 0x58f   : > { %1711 = vrsqrt.f32 %v1135_v15 }
 0x595   : > { %v1710_v24 = vpop.eup %1709 }
 0x596   : > { %v2337_v50 = vmul.f32 %v1710_v24, %v1112_v8  ;;  %v2339_v21 = vmul.f32 %v1710_v24, %v1111_v37 }
 0x598   : > { %v1677_v53 = vpack.c.bf16 %v2337_v50, %v1835_v3  ;;  %v1679_v54 = vpack.c.bf16 %v2339_v21, %v1825_v1  ;;  %v1144_v1 = vpop.permute.xlu0 %1143 }
 0x599   : > { %v1712_v14 = vpop.eup %1711 }
 0x59a   : > { %1678 = vmatprep.subr.bf16.mxu0 %v1677_v53  ;;  %v2345_v18 = vmul.f32 %v1712_v14, %v1128_v36  ;;  %v2347_v17 = vmul.f32 %v1712_v14, %v1127_v51 }
 0x59b   : > { %1680 = vmatpush1.bf16.msra.mxu0 %v1679_v54 }
 0x59c   : > { %v1681_v0 = vpack.c.bf16 %v2345_v18, %v1832_v2  ;;  %v1683_v3 = vpack.c.bf16 %v2347_v17, %v1729_v45 }
 0x59e   : > { %1605 = vmatmul.mubr.msk.f32.vlgmr.msra.gmra.mrb[4].mxu0 %vm1146_vm9, %v1139_v56  ;;  %1682 = vmatprep.subr.bf16.mxu1 %v1681_v0 }
 0x59f   : > { %1684 = vmatpush1.bf16.msra.mxu1 %v1683_v3  ;;  %1403 = vmatprep.mubr.f32.mxu0 %v1745_v4 }
 0x5a2   : > { %1606 = vmatmul.mubr.msk.f32.vlgmr.msra.gmra.mrb[4].mxu1 %vm1146_vm9, %v1139_v56 }
 0x5a3   : > { %1474 = vmatprep.mubr.f32.mxu1 %v1745_v4 }
 0x671   : > { %v1216_v40 = vpop.f32.mrb[4].mxu0 }
 0x672   : > { %v1217_v43 = vadd.f32 %v1216_v40, %v1144_v1  ;;  %v1218_v57 = vpop.f32.mrb[5].mxu0 }
 0x673   : > { %v1219_v58 = vadd.f32 %v1218_v57, %v1144_v1 }
 0x675   : > { %v1287_v59 = vpop.f32.mrb[4].mxu1  ;;  %v1292_v60 = vadd.f32 %v1219_v58, %v1217_v43 }
 0x676   : > { %v1288_v19 = vadd.f32 %v1287_v59, %v1144_v1  ;;  %v1289_v2 = vpop.f32.mrb[5].mxu1 }
 0x677   : > { %v1290_v46 = vadd.f32 %v1289_v2, %v1144_v1  ;;  %1293 = vadd.xlane.f32.xlu1 %v1292_v60 }
 0x679   : > { %v1308_v20 = vadd.f32 %v1290_v46, %v1288_v19 }
 0x67b   : > { %1309 = vadd.xlane.f32.xlu1 %v1308_v20 }
 0x704   : > { %v1294_v39 = vpop.xlane.xlu1 %1293 }
 0x705   : > { %v1295_v34 = vmul.f32 0.00390625, %v1294_v39 }
 0x707   : > { %v1296_v42 = vsub.f32 %v1217_v43, %v1295_v34  ;;  %v1297_v44 = vsub.f32 %v1219_v58, %v1295_v34 }
 0x708   : > { %v1310_v55 = vpop.xlane.xlu1 %1309 }
 0x709   : > { %v1311_v5 = vmul.f32 0.00390625, %v1310_v55  ;;  %v1298_v4 = vmul.f32 %v1296_v42, %v1296_v42  ;;  %v1299_v9 = vmul.f32 %v1297_v44, %v1297_v44 }
 0x70b   : > { %v1312_v32 = vsub.f32 %v1288_v19, %v1311_v5  ;;  %v1313_v28 = vsub.f32 %v1290_v46, %v1311_v5  ;;  %v1300_v12 = vadd.f32 %v1299_v9, %v1298_v4 }
 0x70d   : > { %1301 = vadd.xlane.f32.xlu1 %v1300_v12  ;;  %v1314_v16 = vmul.f32 %v1312_v32, %v1312_v32  ;;  %v1315_v11 = vmul.f32 %v1313_v28, %v1313_v28 }
 0x70f   : > { %v1316_v33 = vadd.f32 %v1315_v11, %v1314_v16 }
 0x711   : > { %1317 = vadd.xlane.f32.xlu1 %v1316_v33 }
 0x722   : > { %1332 = vperm.xlu1 %1704, %v1329_v25  }
 0x79a   : > { %v1302_v61 = vpop.xlane.xlu1 %1301 }
 0x79b   : > { %v1303_v29 = vmul.f32 0.00390625, %v1302_v61 }
 0x79d   : > { %v1304_v63 = vadd.f32 1e-05, %v1303_v29 }
 0x79e   : > { %v1318_v26 = vpop.xlane.xlu1 %1317 }
 0x79f   : > { %1713 = vrsqrt.f32 %v1304_v63  ;;  %v1319_v10 = vmul.f32 0.00390625, %v1318_v26 }
 0x7a1   : > { %v1320_v62 = vadd.f32 1e-05, %v1319_v10 }
 0x7a2   : > { %v1333_v7 = vpop.permute.xlu1 %1332 }
 0x7a3   : > { %1715 = vrsqrt.f32 %v1320_v62 }
 0x7a9   : > { %v1714_v22 = vpop.eup %1713 }
 0x7aa   : > { %v1307_v37 = vmul.f32 %v1714_v22, %v1297_v44  ;;  %v1306_v8 = vmul.f32 %v1714_v22, %v1296_v42 }
 0x7ac   : > { %v1325_v30 = vmax.f32 %v1307_v37, 0.0  ;;  %v1324_v41 = vmax.f32 %v1306_v8, 0.0 }
 0x7ad   : > { %v1716_v47 = vpop.eup %1715 }
 0x7ae   : > { %1339 = vmatprep.subr.mxu0 %v1325_v30  ;;  %v1323_v51 = vmul.f32 %v1716_v47, %v1313_v28  ;;  %v1322_v36 = vmul.f32 %v1716_v47, %v1312_v32 }
 0x7af   : > { %1340 = vmatpush1.msra.mxu0 %v1324_v41 }
 0x7b0   : > { %1607 = vmatmul.mubr.msk.f32.vlgmr.msra.gmra.mrb[6].mxu0 %vm1335_vm10, %v1328_v48  ;;  %v1327_v6 = vmax.f32 %v1323_v51, 0.0  ;;  %v1326_v38 = vmax.f32 %v1322_v36, 0.0 }
 0x7b2   : > { %1410 = vmatprep.subr.mxu1 %v1327_v6 }
 0x7b3   : > { %1411 = vmatpush1.msra.mxu1 %v1326_v38 }
 0x7b4   : > { %1608 = vmatmul.mubr.msk.f32.vlgmr.msra.gmra.mrb[6].mxu1 %vm1335_vm10, %v1328_v48 }
 0x883   : > { %v1405_v23 = vpop.f32.mrb[6].mxu0 }
 0x884   : > { %v1407_v27 = vpop.f32.mrb[7].mxu0  ;;  %v1406_v52 = vadd.f32 %v1405_v23, %v1333_v7 }
 0x885   : > { %v1408_v31 = vadd.f32 %v1407_v27, %v1333_v7 }
 0x887   : > { %v1476_v49 = vpop.f32.mrb[6].mxu1  ;;  %v1481_v13 = vadd.f32 %v1408_v31, %v1406_v52 }
 0x888   : > { %v1477_v35 = vadd.f32 %v1476_v49, %v1333_v7  ;;  %v1478_v15 = vpop.f32.mrb[7].mxu1 }
 0x889   : > { %v1479_v24 = vadd.f32 %v1478_v15, %v1333_v7  ;;  %1482 = vadd.xlane.f32.xlu0 %v1481_v13 }
 0x88b   : > { %v1497_v53 = vadd.f32 %v1479_v24, %v1477_v35 }
 0x88d   : > { %1498 = vadd.xlane.f32.xlu1 %v1497_v53 }
 0x916   : > { %v1483_v54 = vpop.xlane.xlu0 %1482 }
 0x917   : > { %v1484_v14 = vmul.f32 0.00390625, %v1483_v54 }
 0x919   : > { %v1485_v56 = vsub.f32 %v1406_v52, %v1484_v14  ;;  %v1486_v0 = vsub.f32 %v1408_v31, %v1484_v14 }
 0x91a   : > { %v1499_v45 = vpop.xlane.xlu1 %1498 }
 0x91b   : > { %v1500_v3 = vmul.f32 0.00390625, %v1499_v45  ;;  %v1487_v1 = vmul.f32 %v1485_v56, %v1485_v56  ;;  %v1488_v40 = vmul.f32 %v1486_v0, %v1486_v0 }
 0x91d   : > { %v1501_v43 = vsub.f32 %v1477_v35, %v1500_v3  ;;  %v1502_v57 = vsub.f32 %v1479_v24, %v1500_v3  ;;  %v1489_v58 = vadd.f32 %v1488_v40, %v1487_v1 }
 0x91f   : > { %1490 = vadd.xlane.f32.xlu0 %v1489_v58  ;;  %v1503_v59 = vmul.f32 %v1501_v43, %v1501_v43  ;;  %v1504_v60 = vmul.f32 %v1502_v57, %v1502_v57 }
 0x921   : > { %v1505_v19 = vadd.f32 %v1504_v60, %v1503_v59 }
 0x923   : > { %1506 = vadd.xlane.f32.xlu0 %v1505_v19 }
 0x9ac   : > { %v1491_v2 = vpop.xlane.xlu0 %1490 }
 0x9ad   : > { %v1492_v46 = vmul.f32 0.00390625, %v1491_v2 }
 0x9af   : > { %v1493_v20 = vadd.f32 1e-05, %v1492_v46 }
 0x9b0   : > { %v1507_v39 = vpop.xlane.xlu0 %1506 }
 0x9b1   : > { %1717 = vrsqrt.f32 %v1493_v20  ;;  %v1508_v34 = vmul.f32 0.00390625, %v1507_v39 }
 0x9b3   : > { %v1509_v42 = vadd.f32 1e-05, %v1508_v34 }
 0x9b5   : > { %1719 = vrsqrt.f32 %v1509_v42 }
 0x9bb   : > { %v1718_v44 = vpop.eup %1717 }
 0x9bc   : > { %v1495_v55 = vmul.f32 %v1718_v44, %v1485_v56  ;;  %v1496_v5 = vmul.f32 %v1718_v44, %v1486_v0 }
 0x9be   : > { %1721 = vtanh.f32 %v1495_v55 }
 0x9bf   : > { %v1720_v4 = vpop.eup %1719  ;;  %1723 = vtanh.f32 %v1496_v5 }
 0x9c0   : > { %v1511_v9 = vmul.f32 %v1720_v4, %v1501_v43  ;;  %v1512_v32 = vmul.f32 %v1720_v4, %v1502_v57 }
 0x9c2   : > { %1725 = vtanh.f32 %v1511_v9 }
 0x9c3   : > { %1727 = vtanh.f32 %v1512_v32 }
 0x9c8   : > { %v1722_v28 = vpop.eup %1721 }
 0x9c9   : > { %v1724_v12 = vpop.eup %1723  ;;  %v1517_v16 = vmul.f32 2.0, %v1722_v28 }
 0x9ca   : > { %v1518_v11 = vmul.f32 2.0, %v1724_v12 }
 0x9cb   : > { %v1521_v33 = vadd.f32 %v1517_v16, %v2339_v21 }
 0x9cc   : > { %v1726_v25 = vpop.eup %1725  ;;  %v1522_v61 = vadd.f32 %v1518_v11, %v2337_v50 }
 0x9cd   : > { %v1728_v29 = vpop.eup %1727  ;;  %v1525_v63 = vmax.f32 %v1521_v33, 0.0  ;;  %v1519_v26 = vmul.f32 2.0, %v1726_v25 }
 0x9ce   : > { %v1526_v10 = vmax.f32 %v1522_v61, 0.0  ;;  %v1520_v62 = vmul.f32 2.0, %v1728_v29 }
 0x9cf   : > { %1529 = vst [vmem:[%s359_s28] sm:$0xff] %v1525_v63  ;;  %v1523_v22 = vadd.f32 %v1519_v26, %v2347_v17 }
 0x9d0   : > { %1530 = vst [vmem:[%s359_s28 + $0x8] sm:$0xff] %v1526_v10  ;;  %v1524_v37 = vadd.f32 %v1520_v62, %v2345_v18 }
 0x9d1   : > { %v1527_v21 = vmax.f32 %v1523_v22, 0.0 }
 0x9d2   : > { %v1528_v8 = vmax.f32 %v1524_v37, 0.0 }
 0x9d3   : > { %1531 = vst [vmem:[%s359_s28 + $0x10] sm:$0xff] %v1527_v21 }
 0x9d4   : > { %1532 = vst [vmem:[%s359_s28 + $0x18] sm:$0xff] %v1528_v8 }
 0x9d5 PF: > { %s20_s13 = sadd.s32 1, %s1736_s13  }
 0x9d6   : > { %p17_p4 = scmp.ge.s32.totalorder %s20_s13, 4  }
 0x9d8   :  { %19 = sbr.rel (!%p17_p4) target bundleno = 1 (0x1), region = 90 }

</bundles_post_ra>
